<compile_context>
chip_gen: v5e
topology: v5e:2x2
jax: 0.10.0
libtpu: 0.0.40
codegen_flags: <defaults>
</compile_context>

<pallas_src>
import functools

import jax
import jax.numpy as jnp
from jax.experimental import pallas as pl
from jax.experimental.pallas import tpu as pltpu


# --------------------------------------------------------------------------
# Kernels
# --------------------------------------------------------------------------
def feature_transform_kernel(x_ref, w_ref, o_ref, acc_ref):
    """o = X @ W, tiled over (row, k); f32 accumulator, cast on finalize."""
    @pl.when(pl.program_id(1) == 0)
    def _():
        acc_ref[...] = jnp.zeros_like(acc_ref)

    acc_ref[...] += jnp.dot(x_ref[...], w_ref[...],
                            preferred_element_type=jnp.float32)

    @pl.when(pl.program_id(1) == pl.num_programs(1) - 1)
    def _():
        o_ref[...] = acc_ref[...].astype(o_ref.dtype)


def aggregate_relu_transform_kernel(a_ref, m_ref, b1_ref, w2_ref, o_ref,
                                    acc_ref):
    """o = relu(A_hat @ M + b1) @ W2  (layer-1 aggregation fused with the
    layer-2 feature transform; dropout is identity at inference)."""
    @pl.when(pl.program_id(1) == 0)
    def _():
        acc_ref[...] = jnp.zeros_like(acc_ref)

    acc_ref[...] += jnp.dot(a_ref[...], m_ref[...],
                            preferred_element_type=jnp.float32)

    @pl.when(pl.program_id(1) == pl.num_programs(1) - 1)
    def _():
        h = jnp.maximum(acc_ref[...] + b1_ref[...], 0.0)
        # TODO(synk): training-mode dropout (pltpu.prng_seed / prng_random_bits)
        # would be applied to `h` here; eval mode -> identity.
        o_ref[...] = jnp.dot(h.astype(w2_ref.dtype), w2_ref[...],
                             preferred_element_type=jnp.float32
                             ).astype(o_ref.dtype)


def aggregate_logsoftmax_kernel(a_ref, m_ref, b2_ref, o_ref, acc_ref):
    """o = log_softmax(A_hat @ M + b2).  Padded class columns carry -1e30 in
    b2 so they contribute nothing to the normalizer."""
    @pl.when(pl.program_id(1) == 0)
    def _():
        acc_ref[...] = jnp.zeros_like(acc_ref)

    acc_ref[...] += jnp.dot(a_ref[...], m_ref[...],
                            preferred_element_type=jnp.float32)

    @pl.when(pl.program_id(1) == pl.num_programs(1) - 1)
    def _():
        z = acc_ref[...] + b2_ref[...]
        m = jnp.max(z, axis=-1, keepdims=True)
        e = jnp.exp(z - m)
        lse = m + jnp.log(jnp.sum(e, axis=-1, keepdims=True))
        o_ref[...] = z - lse


# --------------------------------------------------------------------------
# Wrapper
# --------------------------------------------------------------------------
def _round_up(x, m):
    return ((x + m - 1) // m) * m


def _pick_contraction_tile(padded_dim, candidates=(512, 256, 128)):
    for c in candidates:
        if padded_dim % c == 0:
            return c
    return padded_dim  # padded_dim is always a multiple of 128


@functools.partial(jax.jit, static_argnames=("compute_dtype", "tile_rows"))
def gcn_forward(a_hat, x, w1, b1, w2, b2, *,
                compute_dtype=jnp.bfloat16, tile_rows=256):
    """Full 2-layer GCN forward. a_hat: (N,N) normalized adjacency."""
    n, f = x.shape
    h = w1.shape[1]
    c = w2.shape[1]

    # --- lane-friendly padded sizes ---
    n_pad = _round_up(n, tile_rows)
    f_pad = _round_up(f, 128)
    h_pad = _round_up(h, 128)
    c_pad = _round_up(c, 128)

    tile_f = _pick_contraction_tile(f_pad)   # K tile for X @ W1
    tile_n = _pick_contraction_tile(n_pad)   # K tile for A_hat aggregations

    # --- pad operands (zeros; b2 padding is -1e30 => log_softmax mask) ---
    a_p = jnp.zeros((n_pad, n_pad), compute_dtype
                    ).at[:n, :n].set(a_hat.astype(compute_dtype))
    x_p = jnp.zeros((n_pad, f_pad), compute_dtype
                    ).at[:n, :f].set(x.astype(compute_dtype))
    w1_p = jnp.zeros((f_pad, h_pad), compute_dtype
                     ).at[:f, :h].set(w1.astype(compute_dtype))
    w2_p = jnp.zeros((h_pad, c_pad), compute_dtype
                     ).at[:h, :c].set(w2.astype(compute_dtype))
    b1_p = jnp.zeros((1, h_pad), jnp.float32
                     ).at[:, :h].set(b1.reshape(1, h).astype(jnp.float32))
    b2_p = jnp.full((1, c_pad), -1e30, jnp.float32
                    ).at[:, :c].set(b2.reshape(1, c).astype(jnp.float32))

    cparams = pltpu.CompilerParams(
        dimension_semantics=("parallel", "arbitrary"),
        vmem_limit_bytes=32 * 1024 * 1024,
    )

    # ---- kernel 1: XW = X @ W1 ----
    xw = pl.pallas_call(
        feature_transform_kernel,
        out_shape=jax.ShapeDtypeStruct((n_pad, h_pad), compute_dtype),
        grid_spec=pltpu.PrefetchScalarGridSpec(
            num_scalar_prefetch=0,
            grid=(n_pad // tile_rows, f_pad // tile_f),
            in_specs=[
                pl.BlockSpec((tile_rows, tile_f), lambda i, k: (i, k)),
                pl.BlockSpec((tile_f, h_pad), lambda i, k: (k, 0)),
            ],
            out_specs=pl.BlockSpec((tile_rows, h_pad), lambda i, k: (i, 0)),
            scratch_shapes=[pltpu.VMEM((tile_rows, h_pad), jnp.float32)],
        ),
        compiler_params=cparams,
    )(x_p, w1_p)

    # ---- kernel 2: HW2 = relu(A_hat @ XW + b1) @ W2 ----
    hw2 = pl.pallas_call(
        aggregate_relu_transform_kernel,
        out_shape=jax.ShapeDtypeStruct((n_pad, c_pad), compute_dtype),
        grid_spec=pltpu.PrefetchScalarGridSpec(
            num_scalar_prefetch=0,
            grid=(n_pad // tile_rows, n_pad // tile_n),
            in_specs=[
                pl.BlockSpec((tile_rows, tile_n), lambda i, k: (i, k)),
                pl.BlockSpec((tile_n, h_pad), lambda i, k: (k, 0)),
                pl.BlockSpec((1, h_pad), lambda i, k: (0, 0)),
                pl.BlockSpec((h_pad, c_pad), lambda i, k: (0, 0)),
            ],
            out_specs=pl.BlockSpec((tile_rows, c_pad), lambda i, k: (i, 0)),
            scratch_shapes=[pltpu.VMEM((tile_rows, h_pad), jnp.float32)],
        ),
        compiler_params=cparams,
    )(a_p, xw, b1_p, w2_p)

    # ---- kernel 3: out = log_softmax(A_hat @ HW2 + b2) ----
    out_p = pl.pallas_call(
        aggregate_logsoftmax_kernel,
        out_shape=jax.ShapeDtypeStruct((n_pad, c_pad), jnp.float32),
        grid_spec=pltpu.PrefetchScalarGridSpec(
            num_scalar_prefetch=0,
            grid=(n_pad // tile_rows, n_pad // tile_n),
            in_specs=[
                pl.BlockSpec((tile_rows, tile_n), lambda i, k: (i, k)),
                pl.BlockSpec((tile_n, c_pad), lambda i, k: (k, 0)),
                pl.BlockSpec((1, c_pad), lambda i, k: (0, 0)),
            ],
            out_specs=pl.BlockSpec((tile_rows, c_pad), lambda i, k: (i, 0)),
            scratch_shapes=[pltpu.VMEM((tile_rows, c_pad), jnp.float32)],
        ),
        compiler_params=cparams,
    )(a_p, hw2, b2_p)

    return out_p[:n, :c]


def build_normalized_adjacency(edge_index, num_nodes):
    """A_hat = D^{-1/2} (A + I) D^{-1/2} densified (GCNConv default norm)."""
    src, dst = edge_index
    adj = jnp.zeros((num_nodes, num_nodes), jnp.float32)
    adj = adj.at[src, dst].set(1.0)
    adj = adj.at[dst, src].set(1.0)                    # undirected (Cora-style)
    adj = adj + jnp.eye(num_nodes, dtype=jnp.float32)  # add self-loops
    deg = jnp.sum(adj, axis=1)
    dinv_sqrt = jnp.where(deg > 0, 1.0 / jnp.sqrt(deg), 0.0)
    return adj * dinv_sqrt[:, None] * dinv_sqrt[None, :]


# --------------------------------------------------------------------------
# Demo / correctness check
# --------------------------------------------------------------------------
if __name__ == "__main__":
    # Small synthetic "Cora-like" graph (Cora: N=2708, F=1433, H=16, C=7).
    N_NODES = 64
    N_FEATS = 32
    HIDDEN = 16
    N_CLASSES = 7
    N_EDGES = 256

    key = jax.random.PRNGKey(0)
    k_x, k_e, k_w1, k_w2 = jax.random.split(key, 4)

    x = jax.random.normal(k_x, (N_NODES, N_FEATS), dtype=jnp.float32)
    edge_index = jax.random.randint(k_e, (2, N_EDGES), 0, N_NODES)
    a_hat = build_normalized_adjacency(edge_index, N_NODES)

    # Deterministic parameter init (GCNConv: glorot-style weight, zero bias).
    w1 = jax.random.normal(k_w1, (N_FEATS, HIDDEN), dtype=jnp.float32) * (
        1.0 / jnp.sqrt(N_FEATS))
    b1 = jnp.zeros((HIDDEN,), dtype=jnp.float32)
    w2 = jax.random.normal(k_w2, (HIDDEN, N_CLASSES), dtype=jnp.float32) * (
        1.0 / jnp.sqrt(HIDDEN))
    b2 = jnp.zeros((N_CLASSES,), dtype=jnp.float32)

    out = gcn_forward(a_hat, x, w1, b1, w2, b2)
    out = jax.block_until_ready(out)

    # Plain-JAX f32 reference.
    h_ref = jnp.maximum(a_hat @ (x @ w1) + b1[None, :], 0.0)
    z_ref = a_hat @ (h_ref @ w2) + b2[None, :]
    ref = jax.nn.log_softmax(z_ref, axis=1)

    assert out.shape == (N_NODES, N_CLASSES)
    assert bool(jnp.all(jnp.isfinite(out))), "non-finite output"
    # bf16 matmul operands (f32 accumulation) -> looser tolerance than f32.
    assert jnp.allclose(out, ref, atol=5e-2), (
        f"mismatch vs reference, max abs err = {jnp.max(jnp.abs(out - ref))}")

    print("KERNEL_OK")
</pallas_src>

<mosaic_0001>
module attributes {stable_mosaic.version = 11 : i64} {
  func.func @aggregate_logsoftmax_kernel(%arg0: i32, %arg1: i32, %arg2: memref<256x256xbf16, #tpu.memory_space<vmem>>, %arg3: memref<256x128xbf16, #tpu.memory_space<vmem>>, %arg4: memref<1x128xf32, #tpu.memory_space<vmem>>, %arg5: memref<256x128xf32, #tpu.memory_space<vmem>>, %arg6: memref<256x128xf32, #tpu.memory_space<vmem>>) attributes {dimension_semantics = [#tpu.dimension_semantics<parallel>, #tpu.dimension_semantics<arbitrary>], iteration_bounds = array<i64: 1, 1>, scalar_prefetch = 0 : i64, scratch_operands = 1 : i64, tpu.core_type = #tpu.core_type<tc>, window_params = [{transform_indices = @transform_0, window_bounds = array<i64: 256, 256>}, {transform_indices = @transform_1, window_bounds = array<i64: 256, 128>}, {pipeline_mode = #tpu.pipeline_mode<synchronous>, transform_indices = @transform_2, window_bounds = array<i64: 1, 128>}, {transform_indices = @transform_3, window_bounds = array<i64: 256, 128>}]} {
    %c0_i32 = arith.constant 0 : i32
    %0 = arith.cmpi eq, %arg1, %c0_i32 : i32
    %1 = arith.extui %0 : i1 to i32
    %c0_i32_0 = arith.constant 0 : i32
    %2 = arith.cmpi ne, %1, %c0_i32_0 : i32
    scf.if %2 {
      %cst_10 = arith.constant 0.000000e+00 : f32
      %12 = vector.broadcast %cst_10 : f32 to vector<256x128xf32>
      %c0_11 = arith.constant 0 : index
      %c0_12 = arith.constant 0 : index
      %13 = vector.load %arg6[%c0_11, %c0_12] : memref<256x128xf32, #tpu.memory_space<vmem>>, vector<256x128xf32>
      tpu.vector_store %arg6[%c0_11, %c0_12], %12 {strides = array<i32>} : memref<256x128xf32, #tpu.memory_space<vmem>>, vector<256x128xf32>,
    } else {
    }
    %c0 = arith.constant 0 : index
    %c0_1 = arith.constant 0 : index
    %3 = vector.load %arg6[%c0, %c0_1] : memref<256x128xf32, #tpu.memory_space<vmem>>, vector<256x128xf32>
    %c0_2 = arith.constant 0 : index
    %c0_3 = arith.constant 0 : index
    %4 = vector.load %arg2[%c0_2, %c0_3] : memref<256x256xbf16, #tpu.memory_space<vmem>>, vector<256x256xbf16>
    %c0_4 = arith.constant 0 : index
    %c0_5 = arith.constant 0 : index
    %5 = vector.load %arg3[%c0_4, %c0_5] : memref<256x128xbf16, #tpu.memory_space<vmem>>, vector<256x128xbf16>
    %cst = arith.constant dense<0.000000e+00> : vector<256x128xf32>
    %6 = tpu.matmul %4, %5, %cst {dimension_numbers = #tpu.dot_dimension_numbers<[1], [0], [0], [1], [0, 0, 1, 1], [], []>} : vector<256x256xbf16>, vector<256x128xbf16>, vector<256x128xf32> -> vector<256x128xf32>
    %7 = arith.addf %3, %6 : vector<256x128xf32>
    %c0_6 = arith.constant 0 : index
    %c0_7 = arith.constant 0 : index
    %8 = vector.load %arg6[%c0_6, %c0_7] : memref<256x128xf32, #tpu.memory_space<vmem>>, vector<256x128xf32>
    tpu.vector_store %arg6[%c0_6, %c0_7], %7 {strides = array<i32>} : memref<256x128xf32, #tpu.memory_space<vmem>>, vector<256x128xf32>,
    %c0_i32_8 = arith.constant 0 : i32
    %9 = arith.cmpi eq, %arg1, %c0_i32_8 : i32
    %10 = arith.extui %9 : i1 to i32
    %c0_i32_9 = arith.constant 0 : i32
    %11 = arith.cmpi ne, %10, %c0_i32_9 : i32
    scf.if %11 {
      %c0_10 = arith.constant 0 : index
      %c0_11 = arith.constant 0 : index
      %12 = vector.load %arg6[%c0_10, %c0_11] : memref<256x128xf32, #tpu.memory_space<vmem>>, vector<256x128xf32>
      %c0_12 = arith.constant 0 : index
      %c0_13 = arith.constant 0 : index
      %13 = vector.load %arg4[%c0_12, %c0_13] : memref<1x128xf32, #tpu.memory_space<vmem>>, vector<1x128xf32>
      %14 = vector.broadcast %13 : vector<1x128xf32> to vector<256x128xf32>
      %15 = arith.addf %12, %14 : vector<256x128xf32>
      %cst_14 = arith.constant dense<0xFF800000> : vector<256xf32>
      %16 = vector.multi_reduction <maximumf>, %15, %cst_14 [1] : vector<256x128xf32> to vector<256xf32>
      %17 = vector.shape_cast %16 : vector<256xf32> to vector<256x1xf32>
      %18 = vector.broadcast %17 : vector<256x1xf32> to vector<256x128xf32>
      %19 = arith.subf %15, %18 : vector<256x128xf32>
      %20 = math.exp %19 : vector<256x128xf32>
      %cst_15 = arith.constant dense<0.000000e+00> : vector<256xf32>
      %21 = vector.multi_reduction <add>, %20, %cst_15 [1] : vector<256x128xf32> to vector<256xf32>
      %22 = vector.shape_cast %21 : vector<256xf32> to vector<256x1xf32>
      %23 = math.log %22 : vector<256x1xf32>
      %24 = arith.addf %17, %23 : vector<256x1xf32>
      %25 = vector.broadcast %24 : vector<256x1xf32> to vector<256x128xf32>
      %26 = arith.subf %15, %25 : vector<256x128xf32>
      %c0_16 = arith.constant 0 : index
      %c0_17 = arith.constant 0 : index
      %27 = vector.load %arg5[%c0_16, %c0_17] : memref<256x128xf32, #tpu.memory_space<vmem>>, vector<256x128xf32>
      tpu.vector_store %arg5[%c0_16, %c0_17], %26 {strides = array<i32>} : memref<256x128xf32, #tpu.memory_space<vmem>>, vector<256x128xf32>,
    } else {
    }
    return
  }
  func.func @transform_0(%arg0: i32, %arg1: i32) -> (i32, i32) {
    %c0_i32 = arith.constant 0 : i32
    return %arg0, %arg1 : i32, i32
  }
  func.func @transform_1(%arg0: i32, %arg1: i32) -> (i32, i32) {
    %c0_i32 = arith.constant 0 : i32
    %c0_i32_0 = arith.constant 0 : i32
    return %arg1, %c0_i32 : i32, i32
  }
  func.func @transform_2(%arg0: i32, %arg1: i32) -> (i32, i32) {
    %c0_i32 = arith.constant 0 : i32
    %c0_i32_0 = arith.constant 0 : i32
    %c0_i32_1 = arith.constant 0 : i32
    return %c0_i32, %c0_i32_0 : i32, i32
  }
  func.func @transform_3(%arg0: i32, %arg1: i32) -> (i32, i32) {
    %c0_i32 = arith.constant 0 : i32
    %c0_i32_0 = arith.constant 0 : i32
    return %arg0, %c0_i32 : i32, i32
  }
}

module attributes {stable_mosaic.version = 11 : i64} {
  func.func @feature_transform_kernel(%arg0: i32, %arg1: i32, %arg2: memref<256x128xbf16, #tpu.memory_space<vmem>>, %arg3: memref<128x128xbf16, #tpu.memory_space<vmem>>, %arg4: memref<256x128xbf16, #tpu.memory_space<vmem>>, %arg5: memref<256x128xf32, #tpu.memory_space<vmem>>) attributes {dimension_semantics = [#tpu.dimension_semantics<parallel>, #tpu.dimension_semantics<arbitrary>], iteration_bounds = array<i64: 1, 1>, scalar_prefetch = 0 : i64, scratch_operands = 1 : i64, tpu.core_type = #tpu.core_type<tc>, window_params = [{transform_indices = @transform_0, window_bounds = array<i64: 256, 128>}, {transform_indices = @transform_1, window_bounds = array<i64: 128, 128>}, {transform_indices = @transform_2, window_bounds = array<i64: 256, 128>}]} {
    %c0_i32 = arith.constant 0 : i32
    %0 = arith.cmpi eq, %arg1, %c0_i32 : i32
    %1 = arith.extui %0 : i1 to i32
    %c0_i32_0 = arith.constant 0 : i32
    %2 = arith.cmpi ne, %1, %c0_i32_0 : i32
    scf.if %2 {
      %cst_10 = arith.constant 0.000000e+00 : f32
      %12 = vector.broadcast %cst_10 : f32 to vector<256x128xf32>
      %c0_11 = arith.constant 0 : index
      %c0_12 = arith.constant 0 : index
      %13 = vector.load %arg5[%c0_11, %c0_12] : memref<256x128xf32, #tpu.memory_space<vmem>>, vector<256x128xf32>
      tpu.vector_store %arg5[%c0_11, %c0_12], %12 {strides = array<i32>} : memref<256x128xf32, #tpu.memory_space<vmem>>, vector<256x128xf32>,
    } else {
    }
    %c0 = arith.constant 0 : index
    %c0_1 = arith.constant 0 : index
    %3 = vector.load %arg5[%c0, %c0_1] : memref<256x128xf32, #tpu.memory_space<vmem>>, vector<256x128xf32>
    %c0_2 = arith.constant 0 : index
    %c0_3 = arith.constant 0 : index
    %4 = vector.load %arg2[%c0_2, %c0_3] : memref<256x128xbf16, #tpu.memory_space<vmem>>, vector<256x128xbf16>
    %c0_4 = arith.constant 0 : index
    %c0_5 = arith.constant 0 : index
    %5 = vector.load %arg3[%c0_4, %c0_5] : memref<128x128xbf16, #tpu.memory_space<vmem>>, vector<128x128xbf16>
    %cst = arith.constant dense<0.000000e+00> : vector<256x128xf32>
    %6 = tpu.matmul %4, %5, %cst {dimension_numbers = #tpu.dot_dimension_numbers<[1], [0], [0], [1], [0, 0, 1, 1], [], []>} : vector<256x128xbf16>, vector<128x128xbf16>, vector<256x128xf32> -> vector<256x128xf32>
    %7 = arith.addf %3, %6 : vector<256x128xf32>
    %c0_6 = arith.constant 0 : index
    %c0_7 = arith.constant 0 : index
    %8 = vector.load %arg5[%c0_6, %c0_7] : memref<256x128xf32, #tpu.memory_space<vmem>>, vector<256x128xf32>
    tpu.vector_store %arg5[%c0_6, %c0_7], %7 {strides = array<i32>} : memref<256x128xf32, #tpu.memory_space<vmem>>, vector<256x128xf32>,
    %c0_i32_8 = arith.constant 0 : i32
    %9 = arith.cmpi eq, %arg1, %c0_i32_8 : i32
    %10 = arith.extui %9 : i1 to i32
    %c0_i32_9 = arith.constant 0 : i32
    %11 = arith.cmpi ne, %10, %c0_i32_9 : i32
    scf.if %11 {
      %c0_10 = arith.constant 0 : index
      %c0_11 = arith.constant 0 : index
      %12 = vector.load %arg5[%c0_10, %c0_11] : memref<256x128xf32, #tpu.memory_space<vmem>>, vector<256x128xf32>
      %13 = arith.truncf %12 : vector<256x128xf32> to vector<256x128xbf16>
      %c0_12 = arith.constant 0 : index
      %c0_13 = arith.constant 0 : index
      %14 = vector.load %arg4[%c0_12, %c0_13] : memref<256x128xbf16, #tpu.memory_space<vmem>>, vector<256x128xbf16>
      tpu.vector_store %arg4[%c0_12, %c0_13], %13 {strides = array<i32>} : memref<256x128xbf16, #tpu.memory_space<vmem>>, vector<256x128xbf16>,
    } else {
    }
    return
  }
  func.func @transform_0(%arg0: i32, %arg1: i32) -> (i32, i32) {
    %c0_i32 = arith.constant 0 : i32
    return %arg0, %arg1 : i32, i32
  }
  func.func @transform_1(%arg0: i32, %arg1: i32) -> (i32, i32) {
    %c0_i32 = arith.constant 0 : i32
    %c0_i32_0 = arith.constant 0 : i32
    return %arg1, %c0_i32 : i32, i32
  }
  func.func @transform_2(%arg0: i32, %arg1: i32) -> (i32, i32) {
    %c0_i32 = arith.constant 0 : i32
    %c0_i32_0 = arith.constant 0 : i32
    return %arg0, %c0_i32 : i32, i32
  }
}

module attributes {stable_mosaic.version = 11 : i64} {
  func.func @aggregate_relu_transform_kernel(%arg0: i32, %arg1: i32, %arg2: memref<256x256xbf16, #tpu.memory_space<vmem>>, %arg3: memref<256x128xbf16, #tpu.memory_space<vmem>>, %arg4: memref<1x128xf32, #tpu.memory_space<vmem>>, %arg5: memref<128x128xbf16, #tpu.memory_space<vmem>>, %arg6: memref<256x128xbf16, #tpu.memory_space<vmem>>, %arg7: memref<256x128xf32, #tpu.memory_space<vmem>>) attributes {dimension_semantics = [#tpu.dimension_semantics<parallel>, #tpu.dimension_semantics<arbitrary>], iteration_bounds = array<i64: 1, 1>, scalar_prefetch = 0 : i64, scratch_operands = 1 : i64, tpu.core_type = #tpu.core_type<tc>, window_params = [{transform_indices = @transform_0, window_bounds = array<i64: 256, 256>}, {transform_indices = @transform_1, window_bounds = array<i64: 256, 128>}, {pipeline_mode = #tpu.pipeline_mode<synchronous>, transform_indices = @transform_2, window_bounds = array<i64: 1, 128>}, {pipeline_mode = #tpu.pipeline_mode<synchronous>, transform_indices = @transform_3, window_bounds = array<i64: 128, 128>}, {transform_indices = @transform_4, window_bounds = array<i64: 256, 128>}]} {
    %c0_i32 = arith.constant 0 : i32
    %0 = arith.cmpi eq, %arg1, %c0_i32 : i32
    %1 = arith.extui %0 : i1 to i32
    %c0_i32_0 = arith.constant 0 : i32
    %2 = arith.cmpi ne, %1, %c0_i32_0 : i32
    scf.if %2 {
      %cst_10 = arith.constant 0.000000e+00 : f32
      %12 = vector.broadcast %cst_10 : f32 to vector<256x128xf32>
      %c0_11 = arith.constant 0 : index
      %c0_12 = arith.constant 0 : index
      %13 = vector.load %arg7[%c0_11, %c0_12] : memref<256x128xf32, #tpu.memory_space<vmem>>, vector<256x128xf32>
      tpu.vector_store %arg7[%c0_11, %c0_12], %12 {strides = array<i32>} : memref<256x128xf32, #tpu.memory_space<vmem>>, vector<256x128xf32>,
    } else {
    }
    %c0 = arith.constant 0 : index
    %c0_1 = arith.constant 0 : index
    %3 = vector.load %arg7[%c0, %c0_1] : memref<256x128xf32, #tpu.memory_space<vmem>>, vector<256x128xf32>
    %c0_2 = arith.constant 0 : index
    %c0_3 = arith.constant 0 : index
    %4 = vector.load %arg2[%c0_2, %c0_3] : memref<256x256xbf16, #tpu.memory_space<vmem>>, vector<256x256xbf16>
    %c0_4 = arith.constant 0 : index
    %c0_5 = arith.constant 0 : index
    %5 = vector.load %arg3[%c0_4, %c0_5] : memref<256x128xbf16, #tpu.memory_space<vmem>>, vector<256x128xbf16>
    %cst = arith.constant dense<0.000000e+00> : vector<256x128xf32>
    %6 = tpu.matmul %4, %5, %cst {dimension_numbers = #tpu.dot_dimension_numbers<[1], [0], [0], [1], [0, 0, 1, 1], [], []>} : vector<256x256xbf16>, vector<256x128xbf16>, vector<256x128xf32> -> vector<256x128xf32>
    %7 = arith.addf %3, %6 : vector<256x128xf32>
    %c0_6 = arith.constant 0 : index
    %c0_7 = arith.constant 0 : index
    %8 = vector.load %arg7[%c0_6, %c0_7] : memref<256x128xf32, #tpu.memory_space<vmem>>, vector<256x128xf32>
    tpu.vector_store %arg7[%c0_6, %c0_7], %7 {strides = array<i32>} : memref<256x128xf32, #tpu.memory_space<vmem>>, vector<256x128xf32>,
    %c0_i32_8 = arith.constant 0 : i32
    %9 = arith.cmpi eq, %arg1, %c0_i32_8 : i32
    %10 = arith.extui %9 : i1 to i32
    %c0_i32_9 = arith.constant 0 : i32
    %11 = arith.cmpi ne, %10, %c0_i32_9 : i32
    scf.if %11 {
      %c0_10 = arith.constant 0 : index
      %c0_11 = arith.constant 0 : index
      %12 = vector.load %arg7[%c0_10, %c0_11] : memref<256x128xf32, #tpu.memory_space<vmem>>, vector<256x128xf32>
      %c0_12 = arith.constant 0 : index
      %c0_13 = arith.constant 0 : index
      %13 = vector.load %arg4[%c0_12, %c0_13] : memref<1x128xf32, #tpu.memory_space<vmem>>, vector<1x128xf32>
      %14 = vector.broadcast %13 : vector<1x128xf32> to vector<256x128xf32>
      %15 = arith.addf %12, %14 : vector<256x128xf32>
      %cst_14 = arith.constant 0.000000e+00 : f32
      %16 = vector.broadcast %cst_14 : f32 to vector<256x128xf32>
      %17 = arith.maximumf %15, %16 : vector<256x128xf32>
      %18 = arith.truncf %17 : vector<256x128xf32> to vector<256x128xbf16>
      %c0_15 = arith.constant 0 : index
      %c0_16 = arith.constant 0 : index
      %19 = vector.load %arg5[%c0_15, %c0_16] : memref<128x128xbf16, #tpu.memory_space<vmem>>, vector<128x128xbf16>
      %cst_17 = arith.constant dense<0.000000e+00> : vector<256x128xf32>
      %20 = tpu.matmul %18, %19, %cst_17 {dimension_numbers = #tpu.dot_dimension_numbers<[1], [0], [0], [1], [0, 0, 1, 1], [], []>} : vector<256x128xbf16>, vector<128x128xbf16>, vector<256x128xf32> -> vector<256x128xf32>
      %21 = arith.truncf %20 : vector<256x128xf32> to vector<256x128xbf16>
      %c0_18 = arith.constant 0 : index
      %c0_19 = arith.constant 0 : index
      %22 = vector.load %arg6[%c0_18, %c0_19] : memref<256x128xbf16, #tpu.memory_space<vmem>>, vector<256x128xbf16>
      tpu.vector_store %arg6[%c0_18, %c0_19], %21 {strides = array<i32>} : memref<256x128xbf16, #tpu.memory_space<vmem>>, vector<256x128xbf16>,
    } else {
    }
    return
  }
  func.func @transform_0(%arg0: i32, %arg1: i32) -> (i32, i32) {
    %c0_i32 = arith.constant 0 : i32
    return %arg0, %arg1 : i32, i32
  }
  func.func @transform_1(%arg0: i32, %arg1: i32) -> (i32, i32) {
    %c0_i32 = arith.constant 0 : i32
    %c0_i32_0 = arith.constant 0 : i32
    return %arg1, %c0_i32 : i32, i32
  }
  func.func @transform_2(%arg0: i32, %arg1: i32) -> (i32, i32) {
    %c0_i32 = arith.constant 0 : i32
    %c0_i32_0 = arith.constant 0 : i32
    %c0_i32_1 = arith.constant 0 : i32
    return %c0_i32, %c0_i32_0 : i32, i32
  }
  func.func @transform_3(%arg0: i32, %arg1: i32) -> (i32, i32) {
    %c0_i32 = arith.constant 0 : i32
    %c0_i32_0 = arith.constant 0 : i32
    %c0_i32_1 = arith.constant 0 : i32
    return %c0_i32, %c0_i32_0 : i32, i32
  }
  func.func @transform_4(%arg0: i32, %arg1: i32) -> (i32, i32) {
    %c0_i32 = arith.constant 0 : i32
    %c0_i32_0 = arith.constant 0 : i32
    return %arg0, %c0_i32 : i32, i32
  }
}

</mosaic_0001>

<bundles_post_ra>
// kernel: gcn_forward.3
= control target key start
LH: loop header
LB: loop body
LE: loop exit
PB: predicated region body
PF: predicated region fallthrough
CT: control target
= control target key end

     0   :  { %s901_s1 = inlined_call_operand.vmem [shape: bf16[128,128], index: 1, kind: input, shape index: {}]   ;;  %s902_s0 = inlined_call_operand.vmem [shape: bf16[256,128], index: 0, kind: input, shape index: {}]   ;;  %s903_s2 = inlined_call_operand.vmem [shape: bf16[256,128], index: 2, kind: output, shape index: {}]  }
   0x1   :  { %v646_v0 = vld [vmem:[%s901_s1 + $0x38] sm:$0xff]  ;;  %v645_v1 = vld [vmem:[%s901_s1 + $0x30] sm:$0xff]  ;;  %v644_v2 = vld [vmem:[%s901_s1 + $0x28] sm:$0xff] }
   0x2   :  { %271 = vmatpush.bf16.msra.mxu0 %v646_v0  ;;  %742 = vmatpush.bf16.msra.mxu1 %v646_v0  ;;  %v643_v3 = vld [vmem:[%s901_s1 + $0x20] sm:$0xff]  ;;  %v642_v4 = vld [vmem:[%s901_s1 + $0x18] sm:$0xff]  ;;  %v641_v5 = vld [vmem:[%s901_s1 + $0x10] sm:$0xff] }
   0x3   :  { %743 = vmatpush.bf16.msra.mxu2 %v646_v0  ;;  %744 = vmatpush.bf16.msra.mxu3 %v646_v0  ;;  %v640_v6 = vld [vmem:[%s901_s1 + $0x8] sm:$0xff]  ;;  %v639_v7 = vld [vmem:[%s901_s1] sm:$0xff]  ;;  %v625_v16 = vld [vmem:[%s902_s0 + $0x10] sm:$0xff] }
   0x4   :  { %v623_v8 = vld [vmem:[%s902_s0] sm:$0xff]  ;;  %v624_v12 = vld [vmem:[%s902_s0 + $0x8] sm:$0xff]  ;;  %v629_v17 = vld [vmem:[%s902_s0 + $0x30] sm:$0xff] }
   0x5   :  { %v627_v9 = vld [vmem:[%s902_s0 + $0x20] sm:$0xff]  ;;  %v628_v13 = vld [vmem:[%s902_s0 + $0x28] sm:$0xff]  ;;  %v633_v18 = vld [vmem:[%s902_s0 + $0x50] sm:$0xff] }
   0x6   :  { %272 = vmatpush.bf16.msra.mxu0 %v645_v1  ;;  %745 = vmatpush.bf16.msra.mxu1 %v645_v1  ;;  %v631_v10 = vld [vmem:[%s902_s0 + $0x40] sm:$0xff]  ;;  %v632_v14 = vld [vmem:[%s902_s0 + $0x48] sm:$0xff]  ;;  %v637_v19 = vld [vmem:[%s902_s0 + $0x70] sm:$0xff] }
   0x7   :  { %746 = vmatpush.bf16.msra.mxu2 %v645_v1  ;;  %747 = vmatpush.bf16.msra.mxu3 %v645_v1  ;;  %v635_v11 = vld [vmem:[%s902_s0 + $0x60] sm:$0xff]  ;;  %v636_v15 = vld [vmem:[%s902_s0 + $0x68] sm:$0xff]  ;;  %v626_v20 = vld [vmem:[%s902_s0 + $0x18] sm:$0xff] }
   0x8   :  { %v630_v21 = vld [vmem:[%s902_s0 + $0x38] sm:$0xff] }
   0x9   :  { %v634_v22 = vld [vmem:[%s902_s0 + $0x58] sm:$0xff] }
   0xa   :  { %273 = vmatpush.bf16.msra.mxu0 %v644_v2  ;;  %748 = vmatpush.bf16.msra.mxu1 %v644_v2  ;;  %v638_v23 = vld [vmem:[%s902_s0 + $0x78] sm:$0xff] }
   0xb   :  { %749 = vmatpush.bf16.msra.mxu2 %v644_v2  ;;  %750 = vmatpush.bf16.msra.mxu3 %v644_v2 }
   0xe   :  { %274 = vmatpush.bf16.msra.mxu0 %v643_v3  ;;  %751 = vmatpush.bf16.msra.mxu1 %v643_v3 }
   0xf   :  { %752 = vmatpush.bf16.msra.mxu2 %v643_v3  ;;  %753 = vmatpush.bf16.msra.mxu3 %v643_v3 }
  0x12   :  { %275 = vmatpush.bf16.msra.mxu0 %v642_v4  ;;  %754 = vmatpush.bf16.msra.mxu1 %v642_v4 }
  0x13   :  { %755 = vmatpush.bf16.msra.mxu2 %v642_v4  ;;  %756 = vmatpush.bf16.msra.mxu3 %v642_v4 }
  0x16   :  { %276 = vmatpush.bf16.msra.mxu0 %v641_v5  ;;  %757 = vmatpush.bf16.msra.mxu1 %v641_v5 }
  0x17   :  { %758 = vmatpush.bf16.msra.mxu2 %v641_v5  ;;  %759 = vmatpush.bf16.msra.mxu3 %v641_v5 }
  0x1a   :  { %277 = vmatpush.bf16.msra.mxu0 %v640_v6  ;;  %760 = vmatpush.bf16.msra.mxu1 %v640_v6 }
  0x1b   :  { %761 = vmatpush.bf16.msra.mxu2 %v640_v6  ;;  %762 = vmatpush.bf16.msra.mxu3 %v640_v6 }
  0x1e   :  { %278 = vmatpush.bf16.msra.mxu0 %v639_v7  ;;  %763 = vmatpush.bf16.msra.mxu1 %v639_v7 }
  0x1f   :  { %764 = vmatpush.bf16.msra.mxu2 %v639_v7  ;;  %765 = vmatpush.bf16.msra.mxu3 %v639_v7 }
  0x21   :  { %279 = vmatmul.bf16.vlgmr.msra.gmra.mxu0 %v623_v8  ;;  %299 = vmatmul.bf16.vlgmr.msra.gmra.mxu1 %v627_v9 }
  0x22   :  { %319 = vmatmul.bf16.vlgmr.msra.gmra.mxu2 %v631_v10  ;;  %339 = vmatmul.bf16.vlgmr.msra.gmra.mxu3 %v635_v11 }
  0x31   :  { %284 = vmatmul.bf16.gmra.mxu0 %v624_v12  ;;  %304 = vmatmul.bf16.gmra.mxu1 %v628_v13 }
  0x32   :  { %324 = vmatmul.bf16.gmra.mxu2 %v632_v14  ;;  %344 = vmatmul.bf16.gmra.mxu3 %v636_v15 }
  0x41   :  { %289 = vmatmul.bf16.gmra.mxu0 %v625_v16  ;;  %309 = vmatmul.bf16.gmra.mxu1 %v629_v17 }
  0x42   :  { %329 = vmatmul.bf16.gmra.mxu2 %v633_v18  ;;  %349 = vmatmul.bf16.gmra.mxu3 %v637_v19 }
  0x51   :  { %294 = vmatmul.bf16.gmra.mxu0 %v626_v20  ;;  %314 = vmatmul.bf16.gmra.mxu1 %v630_v21 }
  0x52   :  { %334 = vmatmul.bf16.gmra.mxu2 %v634_v22  ;;  %354 = vmatmul.bf16.gmra.mxu3 %v638_v23 }
  0x9e   :  { %v280_v24 = vpop.f32.mrf.mxu0  ;;  %v300_v25 = vpop.f32.mrf.mxu1 }
  0xa5   :  { %v320_v26 = vpop.f32.mrf.mxu2  ;;  %v340_v27 = vpop.f32.mrf.mxu3 }
  0xa6   :  { %v282_v28 = vpop.f32.mrf.mxu0  ;;  %v302_v29 = vpop.f32.mrf.mxu1 }
  0xa7   :  { %v650_v30 = vpack.c.bf16 %v282_v28, %v280_v24  ;;  %v670_v31 = vpack.c.bf16 %v302_v29, %v300_v25 }
  0xa9   :  { %651 = vst [vmem:[%s903_s2] sm:$0xff] %v650_v30  }
  0xaa   :  { %730 = vst [vmem:[%s903_s2 + $0x20] sm:$0xff] %v670_v31  }
  0xad   :  { %v322_v32 = vpop.f32.mrf.mxu2  ;;  %v342_v33 = vpop.f32.mrf.mxu3 }
  0xae   :  { %v690_v34 = vpack.c.bf16 %v322_v32, %v320_v26  ;;  %v710_v35 = vpack.c.bf16 %v342_v33, %v340_v27  ;;  %v285_v36 = vpop.f32.mrf.mxu0  ;;  %v305_v37 = vpop.f32.mrf.mxu1 }
  0xb0   :  { %734 = vst [vmem:[%s903_s2 + $0x40] sm:$0xff] %v690_v34  }
  0xb1   :  { %738 = vst [vmem:[%s903_s2 + $0x60] sm:$0xff] %v710_v35  }
  0xb5   :  { %v325_v38 = vpop.f32.mrf.mxu2  ;;  %v345_v39 = vpop.f32.mrf.mxu3 }
  0xb6   :  { %v287_v40 = vpop.f32.mrf.mxu0  ;;  %v307_v41 = vpop.f32.mrf.mxu1 }
  0xb7   :  { %v655_v42 = vpack.c.bf16 %v287_v40, %v285_v36  ;;  %v675_v43 = vpack.c.bf16 %v307_v41, %v305_v37 }
  0xb9   :  { %727 = vst [vmem:[%s903_s2 + $0x8] sm:$0xff] %v655_v42  }
  0xba   :  { %731 = vst [vmem:[%s903_s2 + $0x28] sm:$0xff] %v675_v43  }
  0xbd   :  { %v327_v44 = vpop.f32.mrf.mxu2  ;;  %v347_v45 = vpop.f32.mrf.mxu3 }
  0xbe   :  { %v695_v46 = vpack.c.bf16 %v327_v44, %v325_v38  ;;  %v715_v47 = vpack.c.bf16 %v347_v45, %v345_v39  ;;  %v290_v48 = vpop.f32.mrf.mxu0  ;;  %v310_v49 = vpop.f32.mrf.mxu1 }
  0xc0   :  { %735 = vst [vmem:[%s903_s2 + $0x48] sm:$0xff] %v695_v46  }
  0xc1   :  { %739 = vst [vmem:[%s903_s2 + $0x68] sm:$0xff] %v715_v47  }
  0xc5   :  { %v330_v50 = vpop.f32.mrf.mxu2  ;;  %v350_v51 = vpop.f32.mrf.mxu3 }
  0xc6   :  { %v292_v52 = vpop.f32.mrf.mxu0  ;;  %v312_v53 = vpop.f32.mrf.mxu1 }
  0xc7   :  { %v660_v54 = vpack.c.bf16 %v292_v52, %v290_v48  ;;  %v680_v55 = vpack.c.bf16 %v312_v53, %v310_v49 }
  0xc9   :  { %728 = vst [vmem:[%s903_s2 + $0x10] sm:$0xff] %v660_v54  }
  0xca   :  { %732 = vst [vmem:[%s903_s2 + $0x30] sm:$0xff] %v680_v55  }
  0xcd   :  { %v332_v56 = vpop.f32.mrf.mxu2  ;;  %v352_v57 = vpop.f32.mrf.mxu3 }
  0xce   :  { %v700_v58 = vpack.c.bf16 %v332_v56, %v330_v50  ;;  %v720_v59 = vpack.c.bf16 %v352_v57, %v350_v51  ;;  %v295_v60 = vpop.f32.mrf.mxu0  ;;  %v315_v61 = vpop.f32.mrf.mxu1 }
  0xd0   :  { %736 = vst [vmem:[%s903_s2 + $0x50] sm:$0xff] %v700_v58  }
  0xd1   :  { %740 = vst [vmem:[%s903_s2 + $0x70] sm:$0xff] %v720_v59  }
  0xd5   :  { %v335_v62 = vpop.f32.mrf.mxu2  ;;  %v355_v63 = vpop.f32.mrf.mxu3 }
  0xd6   :  { %v297_v0 = vpop.f32.mrf.mxu0  ;;  %v317_v1 = vpop.f32.mrf.mxu1 }
  0xd7   :  { %v665_v2 = vpack.c.bf16 %v297_v0, %v295_v60  ;;  %v685_v3 = vpack.c.bf16 %v317_v1, %v315_v61 }
  0xd9   :  { %729 = vst [vmem:[%s903_s2 + $0x18] sm:$0xff] %v665_v2  }
  0xda   :  { %733 = vst [vmem:[%s903_s2 + $0x38] sm:$0xff] %v685_v3  }
  0xdd   :  { %v337_v4 = vpop.f32.mrf.mxu2  ;;  %v357_v5 = vpop.f32.mrf.mxu3 }
  0xde   :  { %v705_v6 = vpack.c.bf16 %v337_v4, %v335_v62  ;;  %v725_v7 = vpack.c.bf16 %v357_v5, %v355_v63 }
  0xe0   :  { %737 = vst [vmem:[%s903_s2 + $0x58] sm:$0xff] %v705_v6  }
  0xe1   :  { %741 = vst [vmem:[%s903_s2 + $0x78] sm:$0xff] %v725_v7  }

// kernel: gcn_forward.5
= control target key start
LH: loop header
LB: loop body
LE: loop exit
PB: predicated region body
PF: predicated region fallthrough
CT: control target
= control target key end

     0   :  { %s2169_s1 = inlined_call_operand.vmem [shape: bf16[256,128], index: 1, kind: input, shape index: {}]   ;;  %s2170_s0 = inlined_call_operand.vmem [shape: bf16[256,256], index: 0, kind: input, shape index: {}]   ;;  %s2171_s2 = inlined_call_operand.vmem [shape: f32[1,128], index: 2, kind: input, shape index: {}]   ;;  %s2172_s3 = inlined_call_operand.vmem [shape: f32[256,128], index: 3, kind: output, shape index: {}]  }
   0x1   :  { %v1334_v0 = vld [vmem:[%s2169_s1 + $0x38] sm:$0xff]  ;;  %v1333_v2 = vld [vmem:[%s2169_s1 + $0x30] sm:$0xff]  ;;  %v1332_v4 = vld [vmem:[%s2169_s1 + $0x28] sm:$0xff] }
   0x2   :  { %v1342_v1 = vld [vmem:[%s2169_s1 + $0x78] sm:$0xff]  ;;  %402 = vmatpush.bf16.msra.mxu0 %v1334_v0  ;;  %1343 = vmatpush.bf16.msra.mxu2 %v1334_v0  ;;  %v1341_v3 = vld [vmem:[%s2169_s1 + $0x70] sm:$0xff]  ;;  %v1340_v5 = vld [vmem:[%s2169_s1 + $0x68] sm:$0xff] }
   0x3   :  { %491 = vmatpush.bf16.msra.mxu1 %v1342_v1  ;;  %1351 = vmatpush.bf16.msra.mxu3 %v1342_v1  ;;  %v1331_v6 = vld [vmem:[%s2169_s1 + $0x20] sm:$0xff]  ;;  %v1330_v8 = vld [vmem:[%s2169_s1 + $0x18] sm:$0xff]  ;;  %v1329_v10 = vld [vmem:[%s2169_s1 + $0x10] sm:$0xff] }
   0x4   :  { %v1339_v7 = vld [vmem:[%s2169_s1 + $0x60] sm:$0xff]  ;;  %v1338_v9 = vld [vmem:[%s2169_s1 + $0x58] sm:$0xff]  ;;  %v1337_v11 = vld [vmem:[%s2169_s1 + $0x50] sm:$0xff] }
   0x5   :  { %v1328_v12 = vld [vmem:[%s2169_s1 + $0x8] sm:$0xff]  ;;  %v1327_v14 = vld [vmem:[%s2169_s1] sm:$0xff]  ;;  %v1113_v28 = vld [vmem:[%s2170_s0 + $0x10] sm:$0xf] }
   0x6   :  { %403 = vmatpush.bf16.msra.mxu0 %v1333_v2  ;;  %1344 = vmatpush.bf16.msra.mxu2 %v1333_v2  ;;  %v1336_v13 = vld [vmem:[%s2169_s1 + $0x48] sm:$0xff]  ;;  %v1335_v15 = vld [vmem:[%s2169_s1 + $0x40] sm:$0xff]  ;;  %v1298_v29 = vld [vmem:[%s2170_s0 + $0x14] sm:$0xf0] }
   0x7   :  { %492 = vmatpush.bf16.msra.mxu1 %v1341_v3  ;;  %1352 = vmatpush.bf16.msra.mxu3 %v1341_v3  ;;  %v1105_v16 = vld [vmem:[%s2170_s0] sm:$0xf]  ;;  %v1296_v17 = vld [vmem:[%s2170_s0 + $0x4] sm:$0xf0]  ;;  %v1295_v20 = vld [vmem:[%s2170_s0 + $0x4] sm:$0xf]  ;;  %v1114_v36 = vor.u32 %v1298_v29, %v1113_v28 }
   0x8   :  { %v1169_v18 = vld [vmem:[%s2170_s0 + $0x80] sm:$0xf]  ;;  %v1312_v19 = vld [vmem:[%s2170_s0 + $0x84] sm:$0xf0]  ;;  %v1107_v21 = vld [vmem:[%s2170_s0 + $0x8] sm:$0xf0]  ;;  %v1106_v24 = vor.u32 %v1296_v17, %v1105_v16 }
   0x9   :  { %v1311_v22 = vld [vmem:[%s2170_s0 + $0x84] sm:$0xf]  ;;  %v1171_v23 = vld [vmem:[%s2170_s0 + $0x88] sm:$0xf0]  ;;  %v1170_v25 = vor.u32 %v1312_v19, %v1169_v18  ;;  %v1110_v26 = vor.u32 %v1295_v20, %v1107_v21  ;;  %v1177_v30 = vld [vmem:[%s2170_s0 + $0x90] sm:$0xf] }
   0xa   :  { %404 = vmatpush.bf16.msra.mxu0 %v1332_v4  ;;  %1345 = vmatpush.bf16.msra.mxu2 %v1332_v4  ;;  %v1174_v27 = vor.u32 %v1311_v22, %v1171_v23  ;;  %v1314_v31 = vld [vmem:[%s2170_s0 + $0x94] sm:$0xf0]  ;;  %v1297_v32 = vld [vmem:[%s2170_s0 + $0x14] sm:$0xf]  ;;  %v1115_v33 = vld [vmem:[%s2170_s0 + $0x18] sm:$0xf0] }
   0xb   :  { %493 = vmatpush.bf16.msra.mxu1 %v1340_v5  ;;  %1353 = vmatpush.bf16.msra.mxu3 %v1340_v5  ;;  %v1313_v34 = vld [vmem:[%s2170_s0 + $0x94] sm:$0xf]  ;;  %v1179_v35 = vld [vmem:[%s2170_s0 + $0x98] sm:$0xf0]  ;;  %v1178_v37 = vor.u32 %v1314_v31, %v1177_v30  ;;  %v1118_v38 = vor.u32 %v1297_v32, %v1115_v33  ;;  %v1121_v40 = vld [vmem:[%s2170_s0 + $0x20] sm:$0xf] }
   0xc   :  { %v1182_v39 = vor.u32 %v1313_v34, %v1179_v35  ;;  %v1300_v41 = vld [vmem:[%s2170_s0 + $0x24] sm:$0xf0]  ;;  %v1185_v42 = vld [vmem:[%s2170_s0 + $0xa0] sm:$0xf]  ;;  %v1299_v44 = vld [vmem:[%s2170_s0 + $0x24] sm:$0xf] }
   0xd   :  { %v1316_v43 = vld [vmem:[%s2170_s0 + $0xa4] sm:$0xf0]  ;;  %v1123_v45 = vld [vmem:[%s2170_s0 + $0x28] sm:$0xf0]  ;;  %v1315_v46 = vld [vmem:[%s2170_s0 + $0xa4] sm:$0xf]  ;;  %v1122_v48 = vor.u32 %v1300_v41, %v1121_v40 }
   0xe   :  { %405 = vmatpush.bf16.msra.mxu0 %v1331_v6  ;;  %1346 = vmatpush.bf16.msra.mxu2 %v1331_v6  ;;  %v1187_v47 = vld [vmem:[%s2170_s0 + $0xa8] sm:$0xf0]  ;;  %v1186_v49 = vor.u32 %v1316_v43, %v1185_v42  ;;  %v1126_v50 = vor.u32 %v1299_v44, %v1123_v45  ;;  %v1129_v52 = vld [vmem:[%s2170_s0 + $0x30] sm:$0xf]  ;;  %v1302_v53 = vld [vmem:[%s2170_s0 + $0x34] sm:$0xf0] }
   0xf   :  { %494 = vmatpush.bf16.msra.mxu1 %v1339_v7  ;;  %1354 = vmatpush.bf16.msra.mxu3 %v1339_v7  ;;  %v1190_v51 = vor.u32 %v1315_v46, %v1187_v47  ;;  %v1193_v54 = vld [vmem:[%s2170_s0 + $0xb0] sm:$0xf]  ;;  %v1318_v55 = vld [vmem:[%s2170_s0 + $0xb4] sm:$0xf0]  ;;  %v1301_v56 = vld [vmem:[%s2170_s0 + $0x34] sm:$0xf]  ;;  %v1130_v60 = vor.u32 %v1302_v53, %v1129_v52 }
  0x10   :  { %v1131_v57 = vld [vmem:[%s2170_s0 + $0x38] sm:$0xf0]  ;;  %v1317_v58 = vld [vmem:[%s2170_s0 + $0xb4] sm:$0xf]  ;;  %v1194_v61 = vor.u32 %v1318_v55, %v1193_v54  ;;  %v1137_v0 = vld [vmem:[%s2170_s0 + $0x40] sm:$0xf] }
  0x11   :  { %v1195_v59 = vld [vmem:[%s2170_s0 + $0xb8] sm:$0xf0]  ;;  %v1134_v62 = vor.u32 %v1301_v56, %v1131_v57  ;;  %v1304_v1 = vld [vmem:[%s2170_s0 + $0x44] sm:$0xf0]  ;;  %v1201_v2 = vld [vmem:[%s2170_s0 + $0xc0] sm:$0xf] }
  0x12   :  { %406 = vmatpush.bf16.msra.mxu0 %v1330_v8  ;;  %1347 = vmatpush.bf16.msra.mxu2 %v1330_v8  ;;  %v1198_v63 = vor.u32 %v1317_v58, %v1195_v59  ;;  %v1320_v3 = vld [vmem:[%s2170_s0 + $0xc4] sm:$0xf0]  ;;  %v1303_v4 = vld [vmem:[%s2170_s0 + $0x44] sm:$0xf]  ;;  %v1139_v5 = vld [vmem:[%s2170_s0 + $0x48] sm:$0xf0]  ;;  %v1138_v8 = vor.u32 %v1304_v1, %v1137_v0 }
  0x13   :  { %495 = vmatpush.bf16.msra.mxu1 %v1338_v9  ;;  %1355 = vmatpush.bf16.msra.mxu3 %v1338_v9  ;;  %v1319_v6 = vld [vmem:[%s2170_s0 + $0xc4] sm:$0xf]  ;;  %v1203_v7 = vld [vmem:[%s2170_s0 + $0xc8] sm:$0xf0]  ;;  %v1202_v9 = vor.u32 %v1320_v3, %v1201_v2  ;;  %v1305_v16 = vld [vmem:[%s2170_s0 + $0x54] sm:$0xf] }
  0x14   :  { %v1147_v17 = vld [vmem:[%s2170_s0 + $0x58] sm:$0xf0]  ;;  %v1321_v18 = vld [vmem:[%s2170_s0 + $0xd4] sm:$0xf]  ;;  %v1307_v28 = vld [vmem:[%s2170_s0 + $0x64] sm:$0xf] }
  0x15   :  { %v1211_v19 = vld [vmem:[%s2170_s0 + $0xd8] sm:$0xf0]  ;;  %v1150_v22 = vor.u32 %v1305_v16, %v1147_v17  ;;  %v1155_v29 = vld [vmem:[%s2170_s0 + $0x68] sm:$0xf0]  ;;  %v1323_v30 = vld [vmem:[%s2170_s0 + $0xe4] sm:$0xf] }
  0x16   :  { %407 = vmatpush.bf16.msra.mxu0 %v1329_v10  ;;  %1348 = vmatpush.bf16.msra.mxu2 %v1329_v10  ;;  %v1142_v10 = vor.u32 %v1303_v4, %v1139_v5  ;;  %v1214_v23 = vor.u32 %v1321_v18, %v1211_v19  ;;  %v1219_v31 = vld [vmem:[%s2170_s0 + $0xe8] sm:$0xf0]  ;;  %v1158_v34 = vor.u32 %v1307_v28, %v1155_v29  ;;  %v1309_v40 = vld [vmem:[%s2170_s0 + $0x74] sm:$0xf]  ;;  %v1163_v41 = vld [vmem:[%s2170_s0 + $0x78] sm:$0xf0] }
  0x17   :  { %496 = vmatpush.bf16.msra.mxu1 %v1337_v11  ;;  %1356 = vmatpush.bf16.msra.mxu3 %v1337_v11  ;;  %v1206_v11 = vor.u32 %v1319_v6, %v1203_v7  ;;  %v1222_v35 = vor.u32 %v1323_v30, %v1219_v31  ;;  %v1325_v42 = vld [vmem:[%s2170_s0 + $0xf4] sm:$0xf]  ;;  %v1227_v43 = vld [vmem:[%s2170_s0 + $0xf8] sm:$0xf0]  ;;  %v1166_v46 = vor.u32 %v1309_v40, %v1163_v41 }
  0x18   :  { %v1230_v47 = vor.u32 %v1325_v42, %v1227_v43 }
  0x1a   :  { %408 = vmatpush.bf16.msra.mxu0 %v1328_v12  ;;  %1349 = vmatpush.bf16.msra.mxu2 %v1328_v12  ;;  %v1145_v12 = vld [vmem:[%s2170_s0 + $0x50] sm:$0xf] }
  0x1b   :  { %497 = vmatpush.bf16.msra.mxu1 %v1336_v13  ;;  %1357 = vmatpush.bf16.msra.mxu3 %v1336_v13  ;;  %v1306_v13 = vld [vmem:[%s2170_s0 + $0x54] sm:$0xf0] }
  0x1c   :  { %v1146_v20 = vor.u32 %v1306_v13, %v1145_v12 }
  0x1e   :  { %409 = vmatpush.bf16.msra.mxu0 %v1327_v14  ;;  %1350 = vmatpush.bf16.msra.mxu2 %v1327_v14  ;;  %v1209_v14 = vld [vmem:[%s2170_s0 + $0xd0] sm:$0xf] }
  0x1f   :  { %498 = vmatpush.bf16.msra.mxu1 %v1335_v15  ;;  %1358 = vmatpush.bf16.msra.mxu3 %v1335_v15  ;;  %v1322_v15 = vld [vmem:[%s2170_s0 + $0xd4] sm:$0xf0] }
  0x20   :  { %v1210_v21 = vor.u32 %v1322_v15, %v1209_v14 }
  0x21   :  { %410 = vmatmul.bf16.vlgmr.msra.gmra.mxu0 %v1106_v24  ;;  %450 = vmatmul.bf16.vlgmr.msra.gmra.mxu2 %v1170_v25  ;;  %v1153_v24 = vld [vmem:[%s2170_s0 + $0x60] sm:$0xf]  ;;  %v1308_v25 = vld [vmem:[%s2170_s0 + $0x64] sm:$0xf0] }
  0x22   :  { %499 = vmatmul.bf16.vlgmr.msra.gmra.mxu1 %v1110_v26  ;;  %539 = vmatmul.bf16.vlgmr.msra.gmra.mxu3 %v1174_v27  ;;  %v1217_v26 = vld [vmem:[%s2170_s0 + $0xe0] sm:$0xf]  ;;  %v1324_v27 = vld [vmem:[%s2170_s0 + $0xe4] sm:$0xf0]  ;;  %v1154_v32 = vor.u32 %v1308_v25, %v1153_v24 }
  0x23   :  { %v1218_v33 = vor.u32 %v1324_v27, %v1217_v26 }
  0x31   :  { %415 = vmatmul.bf16.gmra.mxu0 %v1114_v36  ;;  %455 = vmatmul.bf16.gmra.mxu2 %v1178_v37  ;;  %v1161_v36 = vld [vmem:[%s2170_s0 + $0x70] sm:$0xf]  ;;  %v1310_v37 = vld [vmem:[%s2170_s0 + $0x74] sm:$0xf0] }
  0x32   :  { %504 = vmatmul.bf16.gmra.mxu1 %v1118_v38  ;;  %544 = vmatmul.bf16.gmra.mxu3 %v1182_v39  ;;  %v1225_v38 = vld [vmem:[%s2170_s0 + $0xf0] sm:$0xf]  ;;  %v1326_v39 = vld [vmem:[%s2170_s0 + $0xf4] sm:$0xf0]  ;;  %v1162_v44 = vor.u32 %v1310_v37, %v1161_v36 }
  0x33   :  { %v1226_v45 = vor.u32 %v1326_v39, %v1225_v38 }
  0x41   :  { %420 = vmatmul.bf16.gmra.mxu0 %v1122_v48  ;;  %460 = vmatmul.bf16.gmra.mxu2 %v1186_v49  ;;  %v1751_v49 = vld [vmem:[%s2171_s2] ss:$0 sm:$0xff] }
  0x42   :  { %509 = vmatmul.bf16.gmra.mxu1 %v1126_v50  ;;  %549 = vmatmul.bf16.gmra.mxu3 %v1190_v51 }
  0x51   :  { %425 = vmatmul.bf16.gmra.mxu0 %v1130_v60  ;;  %465 = vmatmul.bf16.gmra.mxu2 %v1194_v61 }
  0x52   :  { %514 = vmatmul.bf16.gmra.mxu1 %v1134_v62  ;;  %554 = vmatmul.bf16.gmra.mxu3 %v1198_v63 }
  0x61   :  { %430 = vmatmul.bf16.gmra.mxu0 %v1138_v8  ;;  %470 = vmatmul.bf16.gmra.mxu2 %v1202_v9 }
  0x62   :  { %519 = vmatmul.bf16.gmra.mxu1 %v1142_v10  ;;  %559 = vmatmul.bf16.gmra.mxu3 %v1206_v11 }
  0x71   :  { %435 = vmatmul.bf16.gmra.mxu0 %v1146_v20  ;;  %475 = vmatmul.bf16.gmra.mxu2 %v1210_v21 }
  0x72   :  { %524 = vmatmul.bf16.gmra.mxu1 %v1150_v22  ;;  %564 = vmatmul.bf16.gmra.mxu3 %v1214_v23 }
  0x81   :  { %440 = vmatmul.bf16.gmra.mxu0 %v1154_v32  ;;  %480 = vmatmul.bf16.gmra.mxu2 %v1218_v33 }
  0x82   :  { %529 = vmatmul.bf16.gmra.mxu1 %v1158_v34  ;;  %569 = vmatmul.bf16.gmra.mxu3 %v1222_v35 }
  0x91   :  { %445 = vmatmul.bf16.gmra.mxu0 %v1162_v44  ;;  %485 = vmatmul.bf16.gmra.mxu2 %v1226_v45 }
  0x92   :  { %534 = vmatmul.bf16.gmra.mxu1 %v1166_v46  ;;  %574 = vmatmul.bf16.gmra.mxu3 %v1230_v47 }
  0x9e   :  { %v411_v48 = vpop.f32.mrf.mxu0 }
  0x9f   :  { %v500_v50 = vpop.f32.mrf.mxu1 }
  0xa0   :  { %v501_v51 = vadd.f32 %v500_v50, %v411_v48 }
  0xa2   :  { %v1754_v52 = vadd.f32 %v1751_v49, %v501_v51 }
  0xa4   :  { %715 = vmax.xlane.f32.xlu0 %v1754_v52  ;;  %v451_v53 = vpop.f32.mrf.mxu2 }
  0xa5   :  { %v540_v54 = vpop.f32.mrf.mxu3 }
  0xa6   :  { %v541_v55 = vadd.f32 %v540_v54, %v451_v53  ;;  %v413_v56 = vpop.f32.mrf.mxu0 }
  0xa7   :  { %v502_v57 = vpop.f32.mrf.mxu1 }
  0xa8   :  { %v1758_v58 = vadd.f32 %v1751_v49, %v541_v55  ;;  %v503_v59 = vadd.f32 %v502_v57, %v413_v56 }
  0xaa   :  { %v1761_v60 = vadd.f32 %v1751_v49, %v503_v59  ;;  %747 = vmax.xlane.f32.xlu1 %v1758_v58 }
  0xac   :  { %717 = vmax.xlane.f32.xlu0 %v1761_v60  ;;  %v453_v61 = vpop.f32.mrf.mxu2 }
  0xad   :  { %v542_v62 = vpop.f32.mrf.mxu3 }
  0xae   :  { %v543_v63 = vadd.f32 %v542_v62, %v453_v61  ;;  %v416_v0 = vpop.f32.mrf.mxu0 }
  0xaf   :  { %v505_v1 = vpop.f32.mrf.mxu1 }
  0xb0   :  { %v1766_v2 = vadd.f32 %v1751_v49, %v543_v63  ;;  %v506_v3 = vadd.f32 %v505_v1, %v416_v0 }
  0xb2   :  { %v1769_v4 = vadd.f32 %v1751_v49, %v506_v3  ;;  %749 = vmax.xlane.f32.xlu2 %v1766_v2 }
  0xb4   :  { %719 = vmax.xlane.f32.xlu1 %v1769_v4  ;;  %v456_v5 = vpop.f32.mrf.mxu2 }
  0xb5   :  { %v545_v6 = vpop.f32.mrf.mxu3 }
  0xb6   :  { %v546_v7 = vadd.f32 %v545_v6, %v456_v5  ;;  %v418_v8 = vpop.f32.mrf.mxu0 }
  0xb7   :  { %v507_v9 = vpop.f32.mrf.mxu1 }
  0xb8   :  { %v1774_v10 = vadd.f32 %v1751_v49, %v546_v7  ;;  %v508_v11 = vadd.f32 %v507_v9, %v418_v8 }
  0xba   :  { %v1777_v12 = vadd.f32 %v1751_v49, %v508_v11  ;;  %751 = vmax.xlane.f32.xlu0 %v1774_v10 }
  0xbc   :  { %721 = vmax.xlane.f32.xlu1 %v1777_v12  ;;  %v458_v13 = vpop.f32.mrf.mxu2 }
  0xbd   :  { %v547_v14 = vpop.f32.mrf.mxu3 }
  0xbe   :  { %v548_v15 = vadd.f32 %v547_v14, %v458_v13  ;;  %v421_v16 = vpop.f32.mrf.mxu0 }
  0xbf   :  { %v510_v17 = vpop.f32.mrf.mxu1 }
  0xc0   :  { %v511_v18 = vadd.f32 %v510_v17, %v421_v16  ;;  %v1782_v19 = vadd.f32 %v1751_v49, %v548_v15 }
  0xc2   :  { %v1785_v20 = vadd.f32 %v1751_v49, %v511_v18 }
  0xc4   :  { %723 = vmax.xlane.f32.xlu2 %v1785_v20  ;;  %753 = vmax.xlane.f32.xlu1 %v1782_v19  ;;  %v461_v21 = vpop.f32.mrf.mxu2 }
  0xc5   :  { %v550_v22 = vpop.f32.mrf.mxu3 }
  0xc6   :  { %v551_v23 = vadd.f32 %v550_v22, %v461_v21  ;;  %v423_v24 = vpop.f32.mrf.mxu0 }
  0xc7   :  { %v512_v25 = vpop.f32.mrf.mxu1 }
  0xc8   :  { %v1790_v26 = vadd.f32 %v1751_v49, %v551_v23  ;;  %v513_v29 = vadd.f32 %v512_v25, %v423_v24 }
  0xca   :  { %v1797_v34 = vadd.f32 %v1751_v49, %v513_v29 }
  0xcc   :  { %755 = vmax.xlane.f32.xlu2 %v1790_v26  ;;  %v463_v27 = vpop.f32.mrf.mxu2 }
  0xcd   :  { %v552_v28 = vpop.f32.mrf.mxu3 }
  0xce   :  { %v553_v30 = vadd.f32 %v552_v28, %v463_v27  ;;  %v426_v31 = vpop.f32.mrf.mxu0 }
  0xcf   :  { %v515_v32 = vpop.f32.mrf.mxu1 }
  0xd0   :  { %v1794_v33 = vadd.f32 %v1751_v49, %v553_v30  ;;  %v516_v35 = vadd.f32 %v515_v32, %v426_v31 }
  0xd2   :  { %757 = vmax.xlane.f32.xlu0 %v1794_v33  ;;  %v1802_v38 = vadd.f32 %v1751_v49, %v516_v35 }
  0xd4   :  { %725 = vmax.xlane.f32.xlu2 %v1797_v34  ;;  %v466_v36 = vpop.f32.mrf.mxu2 }
  0xd5   :  { %v555_v37 = vpop.f32.mrf.mxu3 }
  0xd6   :  { %v556_v39 = vadd.f32 %v555_v37, %v466_v36  ;;  %v428_v40 = vpop.f32.mrf.mxu0 }
  0xd7   :  { %v517_v41 = vpop.f32.mrf.mxu1 }
  0xd8   :  { %v1805_v42 = vadd.f32 %v1751_v49, %v556_v39  ;;  %v518_v43 = vadd.f32 %v517_v41, %v428_v40 }
  0xda   :  { %759 = vmax.xlane.f32.xlu1 %v1805_v42  ;;  %727 = vmax.xlane.f32.xlu0 %v1802_v38  ;;  %v1810_v50 = vadd.f32 %v1751_v49, %v518_v43 }
  0xdc   :  { %v468_v44 = vpop.f32.mrf.mxu2 }
  0xdd   :  { %v557_v45 = vpop.f32.mrf.mxu3 }
  0xde   :  { %v558_v46 = vadd.f32 %v557_v45, %v468_v44  ;;  %v431_v47 = vpop.f32.mrf.mxu0 }
  0xdf   :  { %v520_v48 = vpop.f32.mrf.mxu1 }
  0xe0   :  { %v1813_v51 = vadd.f32 %v1751_v49, %v558_v46  ;;  %v521_v53 = vadd.f32 %v520_v48, %v431_v47 }
  0xe2   :  { %761 = vmax.xlane.f32.xlu2 %v1813_v51  ;;  %729 = vmax.xlane.f32.xlu1 %v1810_v50  ;;  %v1818_v56 = vadd.f32 %v1751_v49, %v521_v53 }
  0xe4   :  { %v471_v54 = vpop.f32.mrf.mxu2 }
  0xe5   :  { %v560_v55 = vpop.f32.mrf.mxu3 }
  0xe6   :  { %v561_v57 = vadd.f32 %v560_v55, %v471_v54  ;;  %v433_v59 = vpop.f32.mrf.mxu0 }
  0xe7   :  { %v522_v61 = vpop.f32.mrf.mxu1 }
  0xe8   :  { %v1821_v62 = vadd.f32 %v1751_v49, %v561_v57  ;;  %v523_v63 = vadd.f32 %v522_v61, %v433_v59 }
  0xea   :  { %731 = vmax.xlane.f32.xlu2 %v1818_v56  ;;  %763 = vmax.xlane.f32.xlu0 %v1821_v62  ;;  %v1826_v7 = vadd.f32 %v1751_v49, %v523_v63 }
  0xec   :  { %v473_v0 = vpop.f32.mrf.mxu2  ;;  %2188 = vst [vmem:[#allocation3_spill] sm:$0xff] %v1826_v7 }
  0xed   :  { %v562_v1 = vpop.f32.mrf.mxu3 }
  0xee   :  { %v563_v3 = vadd.f32 %v562_v1, %v473_v0  ;;  %v436_v5 = vpop.f32.mrf.mxu0 }
  0xef   :  { %v525_v6 = vpop.f32.mrf.mxu1 }
  0xf0   :  { %v1829_v8 = vadd.f32 %v1751_v49, %v563_v3  ;;  %v526_v9 = vadd.f32 %v525_v6, %v436_v5 }
  0xf2   :  { %765 = vmax.xlane.f32.xlu1 %v1829_v8  ;;  %733 = vmax.xlane.f32.xlu0 %v1826_v7  ;;  %v1834_v14 = vadd.f32 %v1751_v49, %v526_v9 }
  0xf4   :  { %v476_v11 = vpop.f32.mrf.mxu2  ;;  %2189 = vst [vmem:[#allocation4_spill] sm:$0xff] %v1834_v14 }
  0xf5   :  { %v565_v13 = vpop.f32.mrf.mxu3 }
  0xf6   :  { %v566_v15 = vadd.f32 %v565_v13, %v476_v11  ;;  %v438_v16 = vpop.f32.mrf.mxu0 }
  0xf7   :  { %v527_v17 = vpop.f32.mrf.mxu1 }
  0xf8   :  { %v1837_v18 = vadd.f32 %v1751_v49, %v566_v15  ;;  %v528_v21 = vadd.f32 %v527_v17, %v438_v16 }
  0xfa   :  { %2190 = vst [vmem:[#allocation5_spill] sm:$0xff] %v1837_v18  ;;  %767 = vmax.xlane.f32.xlu2 %v1837_v18  ;;  %735 = vmax.xlane.f32.xlu1 %v1834_v14  ;;  %v1842_v28 = vadd.f32 %v1751_v49, %v528_v21 }
  0xfc   :  { %v478_v22 = vpop.f32.mrf.mxu2  ;;  %2191 = vst [vmem:[#allocation6_spill] sm:$0xff] %v1842_v28 }
  0xfd   :  { %v567_v23 = vpop.f32.mrf.mxu3 }
  0xfe   :  { %v568_v24 = vadd.f32 %v567_v23, %v478_v22  ;;  %v441_v25 = vpop.f32.mrf.mxu0 }
  0xff   :  { %v530_v27 = vpop.f32.mrf.mxu1 }
 0x100   :  { %v1845_v29 = vadd.f32 %v1751_v49, %v568_v24  ;;  %v531_v30 = vadd.f32 %v530_v27, %v441_v25 }
 0x102   :  { %2192 = vst [vmem:[#allocation7_spill] sm:$0xff] %v1845_v29  ;;  %737 = vmax.xlane.f32.xlu2 %v1842_v28  ;;  %769 = vmax.xlane.f32.xlu0 %v1845_v29  ;;  %v1850_v35 = vadd.f32 %v1751_v49, %v531_v30 }
 0x104   :  { %v481_v31 = vpop.f32.mrf.mxu2 }
 0x105   :  { %v570_v32 = vpop.f32.mrf.mxu3 }
 0x106   :  { %v571_v36 = vadd.f32 %v570_v32, %v481_v31  ;;  %v443_v37 = vpop.f32.mrf.mxu0 }
 0x107   :  { %v532_v39 = vpop.f32.mrf.mxu1 }
 0x108   :  { %v1853_v40 = vadd.f32 %v1751_v49, %v571_v36  ;;  %v533_v41 = vadd.f32 %v532_v39, %v443_v37 }
 0x10a   :  { %2193 = vst [vmem:[#allocation8_spill] sm:$0xff] %v1853_v40  ;;  %771 = vmax.xlane.f32.xlu1 %v1853_v40  ;;  %739 = vmax.xlane.f32.xlu0 %v1850_v35  ;;  %v1858_v48 = vadd.f32 %v1751_v49, %v533_v41 }
 0x10c   :  { %v483_v43 = vpop.f32.mrf.mxu2  ;;  %2194 = vst [vmem:[#allocation9_spill] sm:$0xff] %v1858_v48 }
 0x10d   :  { %v572_v44 = vpop.f32.mrf.mxu3 }
 0x10e   :  { %v573_v45 = vadd.f32 %v572_v44, %v483_v43  ;;  %v446_v46 = vpop.f32.mrf.mxu0 }
 0x10f   :  { %v535_v47 = vpop.f32.mrf.mxu1 }
 0x110   :  { %v1861_v53 = vadd.f32 %v1751_v49, %v573_v45  ;;  %v536_v54 = vadd.f32 %v535_v47, %v446_v46 }
 0x112   :  { %2195 = vst [vmem:[#allocation10_spill] sm:$0xff] %v1861_v53  ;;  %773 = vmax.xlane.f32.xlu2 %v1861_v53  ;;  %741 = vmax.xlane.f32.xlu1 %v1858_v48  ;;  %v1866_v59 = vadd.f32 %v1751_v49, %v536_v54 }
 0x114   :  { %v486_v55 = vpop.f32.mrf.mxu2  ;;  %2196 = vst [vmem:[#allocation11_spill] sm:$0xff] %v1866_v59 }
 0x115   :  { %v575_v57 = vpop.f32.mrf.mxu3 }
 0x116   :  { %v576_v61 = vadd.f32 %v575_v57, %v486_v55  ;;  %v448_v3 = vpop.f32.mrf.mxu0 }
 0x117   :  { %v1868_v63 = vpop.xlane.xlu0 %715  ;;  %v537_v5 = vpop.f32.mrf.mxu1 }
 0x118   :  { %v1871_v0 = vadd.f32 %v1751_v49, %v576_v61  ;;  %v779_v1 = vsub.f32 %v1754_v52, %v1868_v63  ;;  %v538_v9 = vadd.f32 %v537_v5, %v448_v3 }
 0x11a   :  { %v811_v6 = vmul.f32 1.442695, %v779_v1  ;;  %743 = vmax.xlane.f32.xlu2 %v1866_v59  ;;  %775 = vmax.xlane.f32.xlu0 %v1871_v0  ;;  %v1882_v21 = vadd.f32 %v1751_v49, %v538_v9 }
 0x11c   :  { %1360 = vpow2.f32 %v811_v6  ;;  %v488_v11 = vpop.f32.mrf.mxu2  ;;  %2197 = vst [vmem:[#allocation12_spill] sm:$0xff] %v1882_v21 }
 0x11d   :  { %v577_v13 = vpop.f32.mrf.mxu3  ;;  %v1877_v15 = vpop.xlane.xlu1 %747 }
 0x11e   :  { %v578_v16 = vadd.f32 %v577_v13, %v488_v11  ;;  %v795_v17 = vsub.f32 %v1758_v58, %v1877_v15 }
 0x11f   :  { %v1887_v24 = vpop.xlane.xlu0 %717 }
 0x120   :  { %v1885_v22 = vadd.f32 %v1751_v49, %v578_v16  ;;  %v843_v23 = vmul.f32 1.442695, %v795_v17  ;;  %v780_v27 = vsub.f32 %v1761_v60, %v1887_v24 }
 0x122   :  { %2198 = vst [vmem:[#allocation13_spill] sm:$0xff] %v1885_v22  ;;  %v1361_v25 = vpop.eup %1360  ;;  %1362 = vpow2.f32 %v843_v23  ;;  %777 = vmax.xlane.f32.xlu1 %v1885_v22  ;;  %745 = vmax.xlane.f32.xlu0 %v1882_v21  ;;  %v813_v49 = vmul.f32 1.442695, %v780_v27 }
 0x123   :  { %875 = vadd.xlane.f32.xlu2 %v1361_v25 }
 0x125   :  { %v1893_v30 = vpop.xlane.xlu2 %749 }
 0x126   :  { %v796_v31 = vsub.f32 %v1766_v2, %v1893_v30 }
 0x127   :  { %v1897_v32 = vpop.xlane.xlu1 %719 }
 0x128   :  { %v1363_v36 = vpop.eup %1362  ;;  %v845_v37 = vmul.f32 1.442695, %v796_v31  ;;  %v781_v39 = vsub.f32 %v1769_v4, %v1897_v32 }
 0x12a   :  { %1364 = vpow2.f32 %v845_v37  ;;  %907 = vadd.xlane.f32.xlu0 %v1363_v36  ;;  %v815_v41 = vmul.f32 1.442695, %v781_v39 }
 0x12b   :  { %1366 = vpow2.f32 %v813_v49 }
 0x12c   :  { %1368 = vpow2.f32 %v815_v41 }
 0x12d   :  { %v1901_v43 = vpop.xlane.xlu0 %751 }
 0x12e   :  { %v797_v44 = vsub.f32 %v1774_v10, %v1901_v43 }
 0x12f   :  { %v1905_v45 = vpop.xlane.xlu1 %721 }
 0x130   :  { %v1365_v46 = vpop.eup %1364  ;;  %v847_v47 = vmul.f32 1.442695, %v797_v44  ;;  %v782_v55 = vsub.f32 %v1777_v12, %v1905_v45 }
 0x131   :  { %v1367_v54 = vpop.eup %1366  ;;  %909 = vadd.xlane.f32.xlu1 %v1365_v46 }
 0x132   :  { %1370 = vpow2.f32 %v847_v47  ;;  %877 = vadd.xlane.f32.xlu0 %v1367_v54  ;;  %v817_v57 = vmul.f32 1.442695, %v782_v55  ;;  %v1369_v61 = vpop.eup %1368 }
 0x134   :  { %1372 = vpow2.f32 %v817_v57 }
 0x137   :  { %v1909_v1 = vpop.xlane.xlu2 %723  ;;  %v1911_v3 = vpop.xlane.xlu1 %753 }
 0x138   :  { %v1371_v5 = vpop.eup %1370  ;;  %v798_v6 = vsub.f32 %v1782_v19, %v1911_v3  ;;  %v783_v11 = vsub.f32 %v1785_v20, %v1909_v1 }
 0x139   :  { %879 = vadd.xlane.f32.xlu1 %v1369_v61  ;;  %911 = vadd.xlane.f32.xlu2 %v1371_v5 }
 0x13a   :  { %v849_v9 = vmul.f32 1.442695, %v798_v6  ;;  %v1373_v16 = vpop.eup %1372  ;;  %v819_v23 = vmul.f32 1.442695, %v783_v11 }
 0x13c   :  { %1374 = vpow2.f32 %v849_v9 }
 0x13f   :  { %v1917_v13 = vpop.xlane.xlu2 %755 }
 0x140   :  { %v799_v17 = vsub.f32 %v1790_v26, %v1917_v13 }
 0x141   :  { %881 = vadd.xlane.f32.xlu2 %v1373_v16 }
 0x142   :  { %v851_v25 = vmul.f32 1.442695, %v799_v17  ;;  %v1375_v27 = vpop.eup %1374 }
 0x143   :  { %913 = vadd.xlane.f32.xlu0 %v1375_v27 }
 0x144   :  { %1376 = vpow2.f32 %v851_v25 }
 0x145   :  { %1378 = vpow2.f32 %v819_v23  ;;  %v1921_v31 = vpop.xlane.xlu0 %757 }
 0x146   :  { %v800_v49 = vsub.f32 %v1794_v33, %v1921_v31 }
 0x147   :  { %v1925_v36 = vpop.xlane.xlu2 %725 }
 0x148   :  { %v853_v37 = vmul.f32 1.442695, %v800_v49  ;;  %v784_v39 = vsub.f32 %v1797_v34, %v1925_v36 }
 0x14a   :  { %v1377_v41 = vpop.eup %1376  ;;  %1380 = vpow2.f32 %v853_v37  ;;  %v821_v44 = vmul.f32 1.442695, %v784_v39 }
 0x14b   :  { %v1379_v46 = vpop.eup %1378  ;;  %915 = vadd.xlane.f32.xlu1 %v1377_v41 }
 0x14c   :  { %1382 = vpow2.f32 %v821_v44  ;;  %883 = vadd.xlane.f32.xlu0 %v1379_v46 }
 0x14d   :  { %v1929_v47 = vpop.xlane.xlu1 %759  ;;  %v1931_v54 = vpop.xlane.xlu0 %727 }
 0x14e   :  { %v801_v55 = vsub.f32 %v1805_v42, %v1929_v47  ;;  %v785_v57 = vsub.f32 %v1802_v38, %v1931_v54 }
 0x150   :  { %v1381_v61 = vpop.eup %1380  ;;  %v855_v5 = vmul.f32 1.442695, %v801_v55  ;;  %v823_v6 = vmul.f32 1.442695, %v785_v57 }
 0x151   :  { %917 = vadd.xlane.f32.xlu2 %v1381_v61 }
 0x152   :  { %v1383_v9 = vpop.eup %1382  ;;  %1384 = vpow2.f32 %v855_v5 }
 0x153   :  { %1386 = vpow2.f32 %v823_v6  ;;  %885 = vadd.xlane.f32.xlu1 %v1383_v9 }
 0x155   :  { %v1937_v11 = vpop.xlane.xlu2 %761  ;;  %v1939_v16 = vpop.xlane.xlu1 %729 }
 0x156   :  { %v802_v17 = vsub.f32 %v1813_v51, %v1937_v11  ;;  %v786_v23 = vsub.f32 %v1810_v50, %v1939_v16 }
 0x158   :  { %v1385_v25 = vpop.eup %1384  ;;  %v857_v27 = vmul.f32 1.442695, %v802_v17  ;;  %v825_v49 = vmul.f32 1.442695, %v786_v23 }
 0x159   :  { %v1387_v37 = vpop.eup %1386  ;;  %919 = vadd.xlane.f32.xlu0 %v1385_v25 }
 0x15a   :  { %1388 = vpow2.f32 %v857_v27  ;;  %887 = vadd.xlane.f32.xlu2 %v1387_v37 }
 0x15b   :  { %1390 = vpow2.f32 %v825_v49 }
 0x15d   :  { %v1945_v39 = vpop.xlane.xlu2 %731  ;;  %v1947_v41 = vpop.xlane.xlu0 %763 }
 0x15e   :  { %v787_v44 = vsub.f32 %v1818_v56, %v1945_v39  ;;  %v803_v46 = vsub.f32 %v1821_v62, %v1947_v41 }
 0x160   :  { %v1389_v55 = vpop.eup %1388  ;;  %v827_v57 = vmul.f32 1.442695, %v787_v44  ;;  %v859_v61 = vmul.f32 1.442695, %v803_v46 }
 0x161   :  { %v1391_v5 = vpop.eup %1390  ;;  %921 = vadd.xlane.f32.xlu1 %v1389_v55 }
 0x162   :  { %1392 = vpow2.f32 %v827_v57  ;;  %889 = vadd.xlane.f32.xlu0 %v1391_v5 }
 0x163   :  { %1394 = vpow2.f32 %v859_v61 }
 0x165   :  { %v1953_v6 = vpop.xlane.xlu1 %765  ;;  %v1955_v9 = vpop.xlane.xlu0 %733 }
 0x166   :  { %v804_v17 = vsub.f32 %v1829_v8, %v1953_v6  ;;  %v788_v23 = vsub.f32 %v1826_v7, %v1955_v9 }
 0x168   :  { %v1393_v25 = vpop.eup %1392  ;;  %v861_v27 = vmul.f32 1.442695, %v804_v17  ;;  %v829_v49 = vmul.f32 1.442695, %v788_v23 }
 0x169   :  { %v1395_v37 = vpop.eup %1394  ;;  %891 = vadd.xlane.f32.xlu1 %v1393_v25 }
 0x16a   :  { %1396 = vpow2.f32 %v861_v27  ;;  %923 = vadd.xlane.f32.xlu2 %v1395_v37 }
 0x16b   :  { %1398 = vpow2.f32 %v829_v49 }
 0x16d   :  { %v1961_v44 = vpop.xlane.xlu2 %767  ;;  %v1963_v46 = vpop.xlane.xlu1 %735 }
 0x16e   :  { %v805_v55 = vsub.f32 %v1837_v18, %v1961_v44  ;;  %v789_v57 = vsub.f32 %v1834_v14, %v1963_v46 }
 0x170   :  { %v1397_v61 = vpop.eup %1396  ;;  %v863_v5 = vmul.f32 1.442695, %v805_v55  ;;  %v831_v7 = vmul.f32 1.442695, %v789_v57 }
 0x171   :  { %v1399_v17 = vpop.eup %1398  ;;  %925 = vadd.xlane.f32.xlu0 %v1397_v61 }
 0x172   :  { %1400 = vpow2.f32 %v863_v5  ;;  %893 = vadd.xlane.f32.xlu2 %v1399_v17 }
 0x173   :  { %1402 = vpow2.f32 %v831_v7 }
 0x175   :  { %v1969_v23 = vpop.xlane.xlu2 %737  ;;  %v1971_v25 = vpop.xlane.xlu0 %769 }
 0x176   :  { %v790_v27 = vsub.f32 %v1842_v28, %v1969_v23  ;;  %v806_v49 = vsub.f32 %v1845_v29, %v1971_v25 }
 0x178   :  { %v1401_v37 = vpop.eup %1400  ;;  %v833_v14 = vmul.f32 1.442695, %v790_v27  ;;  %v865_v18 = vmul.f32 1.442695, %v806_v49 }
 0x179   :  { %v1403_v55 = vpop.eup %1402  ;;  %927 = vadd.xlane.f32.xlu1 %v1401_v37 }
 0x17a   :  { %1404 = vpow2.f32 %v833_v14  ;;  %895 = vadd.xlane.f32.xlu0 %v1403_v55 }
 0x17b   :  { %1406 = vpow2.f32 %v865_v18 }
 0x17d   :  { %v1977_v57 = vpop.xlane.xlu1 %771  ;;  %v1979_v7 = vpop.xlane.xlu0 %739 }
 0x17e   :  { %v807_v61 = vsub.f32 %v1853_v40, %v1977_v57  ;;  %v791_v5 = vsub.f32 %v1850_v35, %v1979_v7 }
 0x180   :  { %v1405_v17 = vpop.eup %1404  ;;  %v867_v29 = vmul.f32 1.442695, %v807_v61  ;;  %v835_v28 = vmul.f32 1.442695, %v791_v5 }
 0x181   :  { %v1407_v27 = vpop.eup %1406  ;;  %897 = vadd.xlane.f32.xlu1 %v1405_v17 }
 0x182   :  { %1408 = vpow2.f32 %v867_v29  ;;  %929 = vadd.xlane.f32.xlu2 %v1407_v27 }
 0x183   :  { %1410 = vpow2.f32 %v835_v28 }
 0x185   :  { %v1985_v14 = vpop.xlane.xlu2 %773  ;;  %v1987_v18 = vpop.xlane.xlu1 %741 }
 0x186   :  { %2199 = vst [vmem:[#allocation14_spill] sm:$0xff] %v1985_v14  ;;  %v792_v49 = vsub.f32 %v1858_v48, %v1987_v18  ;;  %v808_v27 = vsub.f32 %v1861_v53, %v1985_v14 }
 0x187   :  { %2200 = vst [vmem:[#allocation15_spill] sm:$0xff] %v1987_v18 }
 0x188   :  { %v1409_v37 = vpop.eup %1408  ;;  %v837_v55 = vmul.f32 1.442695, %v792_v49  ;;  %v869_v48 = vmul.f32 1.442695, %v808_v27 }
 0x189   :  { %v1411_v40 = vpop.eup %1410  ;;  %931 = vadd.xlane.f32.xlu0 %v1409_v37 }
 0x18a   :  { %899 = vadd.xlane.f32.xlu2 %v1411_v40  ;;  %1412 = vpow2.f32 %v837_v55 }
 0x18d   :  { %v1991_v61 = vpop.xlane.xlu2 %743  ;;  %v1993_v5 = vpop.xlane.xlu0 %775 }
 0x18e   :  { %2201 = vst [vmem:[#allocation16_spill] sm:$0xff] %v1991_v61  ;;  %v793_v28 = vsub.f32 %v1866_v59, %v1991_v61 }
 0x190   :  { %v839_v29 = vmul.f32 1.442695, %v793_v28  ;;  %v1413_v17 = vpop.eup %1412 }
 0x191   :  { %901 = vadd.xlane.f32.xlu0 %v1413_v17 }
 0x192   :  { %1414 = vpow2.f32 %v839_v29  ;;  %v809_v29 = vsub.f32 %v1871_v0, %v1993_v5 }
 0x195   :  { %v1999_v49 = vpop.xlane.xlu1 %777  ;;  %v2001_v37 = vpop.xlane.xlu0 %745 }
 0x196   :  { %2202 = vst [vmem:[#allocation17_spill] sm:$0xff] %v1999_v49  ;;  %v810_v40 = vsub.f32 %v1885_v22, %v1999_v49  ;;  %v794_v55 = vsub.f32 %v1882_v21, %v2001_v37  ;;  %v876_v18 = vpop.xlane.xlu2 %875  ;;  %v871_v49 = vmul.f32 1.442695, %v809_v29 }
 0x197   :  { %1416 = vlog2.f32 %v876_v18 }
 0x198   :  { %v1415_v28 = vpop.eup %1414  ;;  %v873_v59 = vmul.f32 1.442695, %v810_v40  ;;  %v841_v61 = vmul.f32 1.442695, %v794_v55  ;;  %1418 = vpow2.f32 %v869_v48 }
 0x199   :  { %903 = vadd.xlane.f32.xlu1 %v1415_v28 }
 0x19a   :  { %1420 = vpow2.f32 %v873_v59 }
 0x19b   :  { %1422 = vpow2.f32 %v841_v61 }
 0x19d   :  { %v1417_v17 = vpop.eup %1416  ;;  %v908_v27 = vpop.xlane.xlu0 %907 }
 0x19e   :  { %v940_v53 = vmul.f32 0.6931472, %v1417_v17  ;;  %1424 = vlog2.f32 %v908_v27  ;;  %v1419_v22 = vpop.eup %1418 }
 0x19f   :  { %1426 = vpow2.f32 %v871_v49 }
 0x1a0   :  { %v1421_v14 = vpop.eup %1420  ;;  %v1003_v21 = vadd.f32 %v940_v53, %v1868_v63 }
 0x1a1   :  { %v1423_v18 = vpop.eup %1422  ;;  %933 = vadd.xlane.f32.xlu1 %v1419_v22  ;;  %937 = vadd.xlane.f32.xlu0 %v1421_v14 }
 0x1a2   :  { %v1035_v48 = vsub.f32 %v1754_v52, %v1003_v21  ;;  %905 = vadd.xlane.f32.xlu2 %v1423_v18 }
 0x1a4   :  { %v1425_v59 = vpop.eup %1424  ;;  %1067 = vst [vmem:[%s2172_s3] sm:$0xff] %v1035_v48  ;;  %v910_v61 = vpop.xlane.xlu1 %909 }
 0x1a5   :  { %v972_v40 = vmul.f32 0.6931472, %v1425_v59  ;;  %1428 = vlog2.f32 %v910_v61  ;;  %v878_v55 = vpop.xlane.xlu0 %877  ;;  %v1427_v53 = vpop.eup %1426 }
 0x1a6   :  { %1430 = vlog2.f32 %v878_v55 }
 0x1a7   :  { %v1019_v28 = vadd.f32 %v972_v40, %v1877_v15 }
 0x1a9   :  { %v1051_v63 = vsub.f32 %v1758_v58, %v1019_v28 }
 0x1aa   :  { %935 = vadd.xlane.f32.xlu2 %v1427_v53 }
 0x1ab   :  { %v1429_v22 = vpop.eup %1428  ;;  %1083 = vst [vmem:[%s2172_s3 + $0x80] sm:$0xff] %v1051_v63 }
 0x1ac   :  { %v1431_v52 = vpop.eup %1430  ;;  %v974_v21 = vmul.f32 0.6931472, %v1429_v22  ;;  %v880_v14 = vpop.xlane.xlu1 %879 }
 0x1ad   :  { %v912_v49 = vpop.xlane.xlu2 %911  ;;  %v942_v29 = vmul.f32 0.6931472, %v1431_v52  ;;  %1432 = vlog2.f32 %v880_v14 }
 0x1ae   :  { %v1020_v17 = vadd.f32 %v974_v21, %v1893_v30  ;;  %1434 = vlog2.f32 %v912_v49 }
 0x1af   :  { %v1004_v15 = vadd.f32 %v942_v29, %v1887_v24 }
 0x1b0   :  { %v1052_v27 = vsub.f32 %v1766_v2, %v1020_v17 }
 0x1b1   :  { %v1036_v58 = vsub.f32 %v1761_v60, %v1004_v15 }
 0x1b2   :  { %1084 = vst [vmem:[%s2172_s3 + $0x88] sm:$0xff] %v1052_v27 }
 0x1b3   :  { %v1433_v18 = vpop.eup %1432  ;;  %1068 = vst [vmem:[%s2172_s3 + $0x8] sm:$0xff] %v1036_v58 }
 0x1b4   :  { %v1435_v48 = vpop.eup %1434  ;;  %v944_v59 = vmul.f32 0.6931472, %v1433_v18 }
 0x1b5   :  { %v882_v61 = vpop.xlane.xlu2 %881  ;;  %v976_v30 = vmul.f32 0.6931472, %v1435_v48 }
 0x1b6   :  { %1436 = vlog2.f32 %v882_v61  ;;  %v1005_v24 = vadd.f32 %v944_v59, %v1897_v32  ;;  %v914_v40 = vpop.xlane.xlu0 %913 }
 0x1b7   :  { %v1021_v2 = vadd.f32 %v976_v30, %v1901_v43  ;;  %1438 = vlog2.f32 %v914_v40 }
 0x1b8   :  { %v1037_v60 = vsub.f32 %v1769_v4, %v1005_v24 }
 0x1b9   :  { %v1053_v55 = vsub.f32 %v1774_v10, %v1021_v2 }
 0x1ba   :  { %1069 = vst [vmem:[%s2172_s3 + $0x10] sm:$0xff] %v1037_v60 }
 0x1bb   :  { %1085 = vst [vmem:[%s2172_s3 + $0x90] sm:$0xff] %v1053_v55 }
 0x1bc   :  { %v1437_v28 = vpop.eup %1436 }
 0x1bd   :  { %v946_v53 = vmul.f32 0.6931472, %v1437_v28  ;;  %v1439_v63 = vpop.eup %1438 }
 0x1be   :  { %v916_v43 = vpop.xlane.xlu1 %915  ;;  %v978_v22 = vmul.f32 0.6931472, %v1439_v63 }
 0x1bf   :  { %v1006_v32 = vadd.f32 %v946_v53, %v1905_v45  ;;  %1440 = vlog2.f32 %v916_v43  ;;  %v884_v4 = vpop.xlane.xlu0 %883 }
 0x1c0   :  { %1442 = vlog2.f32 %v884_v4  ;;  %v1022_v10 = vadd.f32 %v978_v22, %v1911_v3 }
 0x1c1   :  { %v1038_v52 = vsub.f32 %v1777_v12, %v1006_v32 }
 0x1c2   :  { %v1054_v21 = vsub.f32 %v1782_v19, %v1022_v10 }
 0x1c3   :  { %1070 = vst [vmem:[%s2172_s3 + $0x18] sm:$0xff] %v1038_v52 }
 0x1c4   :  { %v918_v14 = vpop.xlane.xlu2 %917  ;;  %1086 = vst [vmem:[%s2172_s3 + $0x98] sm:$0xff] %v1054_v21 }
 0x1c5   :  { %v1441_v49 = vpop.eup %1440  ;;  %1444 = vlog2.f32 %v918_v14 }
 0x1c6   :  { %v1443_v45 = vpop.eup %1442  ;;  %v980_v29 = vmul.f32 0.6931472, %v1441_v49  ;;  %v886_v17 = vpop.xlane.xlu1 %885 }
 0x1c7   :  { %v948_v12 = vmul.f32 0.6931472, %v1443_v45  ;;  %1446 = vlog2.f32 %v886_v17 }
 0x1c8   :  { %v1023_v3 = vadd.f32 %v980_v29, %v1917_v13 }
 0x1c9   :  { %v1007_v15 = vadd.f32 %v948_v12, %v1909_v1 }
 0x1ca   :  { %v1055_v27 = vsub.f32 %v1790_v26, %v1023_v3 }
 0x1cb   :  { %v1445_v58 = vpop.eup %1444  ;;  %v1039_v19 = vsub.f32 %v1785_v20, %v1007_v15 }
 0x1cc   :  { %1087 = vst [vmem:[%s2172_s3 + $0xa0] sm:$0xff] %v1055_v27  ;;  %v982_v18 = vmul.f32 0.6931472, %v1445_v58  ;;  %v920_v48 = vpop.xlane.xlu0 %919  ;;  %v2203_v27 = vld [vmem:[#allocation3_spill] sm:$0xff] }
 0x1cd   :  { %v1447_v59 = vpop.eup %1446  ;;  %1071 = vst [vmem:[%s2172_s3 + $0x20] sm:$0xff] %v1039_v19  ;;  %v888_v61 = vpop.xlane.xlu2 %887  ;;  %1448 = vlog2.f32 %v920_v48 }
 0x1ce   :  { %v1024_v1 = vadd.f32 %v982_v18, %v1921_v31  ;;  %v950_v13 = vmul.f32 0.6931472, %v1447_v59  ;;  %1450 = vlog2.f32 %v888_v61 }
 0x1d0   :  { %v1056_v26 = vsub.f32 %v1794_v33, %v1024_v1  ;;  %v1008_v20 = vadd.f32 %v950_v13, %v1925_v36  ;;  %v2204_v1 = vld [vmem:[#allocation5_spill] sm:$0xff] }
 0x1d2   :  { %1088 = vst [vmem:[%s2172_s3 + $0xa8] sm:$0xff] %v1056_v26  ;;  %v1040_v30 = vsub.f32 %v1797_v34, %v1008_v20  ;;  %v2205_v26 = vld [vmem:[#allocation4_spill] sm:$0xff] }
 0x1d3   :  { %v1449_v24 = vpop.eup %1448 }
 0x1d4   :  { %v1451_v2 = vpop.eup %1450  ;;  %1072 = vst [vmem:[%s2172_s3 + $0x28] sm:$0xff] %v1040_v30  ;;  %v984_v40 = vmul.f32 0.6931472, %v1449_v24  ;;  %v922_v31 = vpop.xlane.xlu1 %921 }
 0x1d5   :  { %v952_v60 = vmul.f32 0.6931472, %v1451_v2  ;;  %1452 = vlog2.f32 %v922_v31  ;;  %v890_v55 = vpop.xlane.xlu0 %889 }
 0x1d6   :  { %v1025_v33 = vadd.f32 %v984_v40, %v1929_v47  ;;  %1454 = vlog2.f32 %v890_v55  ;;  %v2206_v55 = vld [vmem:[#allocation6_spill] sm:$0xff] }
 0x1d7   :  { %v1009_v36 = vadd.f32 %v952_v60, %v1931_v54 }
 0x1d8   :  { %v1057_v28 = vsub.f32 %v1805_v42, %v1025_v33 }
 0x1d9   :  { %v1041_v34 = vsub.f32 %v1802_v38, %v1009_v36  ;;  %v2207_v36 = vld [vmem:[#allocation7_spill] sm:$0xff] }
 0x1da   :  { %1089 = vst [vmem:[%s2172_s3 + $0xb0] sm:$0xff] %v1057_v28 }
 0x1db   :  { %v1453_v53 = vpop.eup %1452  ;;  %1073 = vst [vmem:[%s2172_s3 + $0x30] sm:$0xff] %v1041_v34 }
 0x1dc   :  { %v1455_v63 = vpop.eup %1454  ;;  %v986_v32 = vmul.f32 0.6931472, %v1453_v53  ;;  %v892_v43 = vpop.xlane.xlu1 %891 }
 0x1dd   :  { %v954_v47 = vmul.f32 0.6931472, %v1455_v63  ;;  %1456 = vlog2.f32 %v892_v43  ;;  %v924_v22 = vpop.xlane.xlu2 %923 }
 0x1de   :  { %v1026_v54 = vadd.f32 %v986_v32, %v1937_v11  ;;  %1458 = vlog2.f32 %v924_v22 }
 0x1df   :  { %v1010_v38 = vadd.f32 %v954_v47, %v1939_v16  ;;  %v2208_v47 = vld [vmem:[#allocation8_spill] sm:$0xff] }
 0x1e0   :  { %v1058_v42 = vsub.f32 %v1813_v51, %v1026_v54 }
 0x1e1   :  { %v1042_v4 = vsub.f32 %v1810_v50, %v1010_v38 }
 0x1e2   :  { %1090 = vst [vmem:[%s2172_s3 + $0xb8] sm:$0xff] %v1058_v42 }
 0x1e3   :  { %v1457_v52 = vpop.eup %1456  ;;  %1074 = vst [vmem:[%s2172_s3 + $0x38] sm:$0xff] %v1042_v4 }
 0x1e4   :  { %v1459_v10 = vpop.eup %1458  ;;  %v956_v21 = vmul.f32 0.6931472, %v1457_v52  ;;  %v926_v14 = vpop.xlane.xlu0 %925 }
 0x1e5   :  { %v988_v11 = vmul.f32 0.6931472, %v1459_v10  ;;  %v894_v49 = vpop.xlane.xlu2 %893  ;;  %1460 = vlog2.f32 %v926_v14  ;;  %v2210_v10 = vld [vmem:[#allocation9_spill] sm:$0xff] }
 0x1e6   :  { %v1011_v16 = vadd.f32 %v956_v21, %v1945_v39  ;;  %1462 = vlog2.f32 %v894_v49 }
 0x1e7   :  { %v1027_v50 = vadd.f32 %v988_v11, %v1947_v41 }
 0x1e8   :  { %v1043_v51 = vsub.f32 %v1818_v56, %v1011_v16  ;;  %v2211_v16 = vld [vmem:[#allocation16_spill] sm:$0xff] }
 0x1e9   :  { %v1059_v45 = vsub.f32 %v1821_v62, %v1027_v50 }
 0x1ea   :  { %1075 = vst [vmem:[%s2172_s3 + $0x40] sm:$0xff] %v1043_v51  ;;  %v2212_v51 = vld [vmem:[#allocation11_spill] sm:$0xff] }
 0x1eb   :  { %v1461_v29 = vpop.eup %1460  ;;  %1091 = vst [vmem:[%s2172_s3 + $0xc0] sm:$0xff] %v1059_v45 }
 0x1ec   :  { %v1463_v17 = vpop.eup %1462  ;;  %v990_v12 = vmul.f32 0.6931472, %v1461_v29  ;;  %v928_v3 = vpop.xlane.xlu1 %927 }
 0x1ed   :  { %v958_v39 = vmul.f32 0.6931472, %v1463_v17  ;;  %1464 = vlog2.f32 %v928_v3  ;;  %v896_v15 = vpop.xlane.xlu0 %895 }
 0x1ee   :  { %v1028_v41 = vadd.f32 %v990_v12, %v1953_v6  ;;  %1466 = vlog2.f32 %v896_v15 }
 0x1ef   :  { %v1012_v56 = vadd.f32 %v958_v39, %v1955_v9 }
 0x1f0   :  { %v1060_v62 = vsub.f32 %v1829_v8, %v1028_v41  ;;  %v2213_v41 = vld [vmem:[#allocation14_spill] sm:$0xff] }
 0x1f1   :  { %v1044_v58 = vsub.f32 %v2203_v27, %v1012_v56 }
 0x1f2   :  { %1092 = vst [vmem:[%s2172_s3 + $0xc8] sm:$0xff] %v1060_v62 }
 0x1f3   :  { %v1465_v19 = vpop.eup %1464  ;;  %1076 = vst [vmem:[%s2172_s3 + $0x48] sm:$0xff] %v1044_v58  ;;  %v2214_v58 = vld [vmem:[#allocation10_spill] sm:$0xff] }
 0x1f4   :  { %v1467_v18 = vpop.eup %1466  ;;  %v992_v48 = vmul.f32 0.6931472, %v1465_v19  ;;  %v898_v59 = vpop.xlane.xlu1 %897 }
 0x1f5   :  { %v960_v6 = vmul.f32 0.6931472, %v1467_v18  ;;  %1468 = vlog2.f32 %v898_v59  ;;  %v930_v61 = vpop.xlane.xlu2 %929  ;;  %v2215_v18 = vld [vmem:[#allocation17_spill] sm:$0xff]  ;;  %v2216_v59 = vld [vmem:[#allocation12_spill] sm:$0xff] }
 0x1f6   :  { %v1029_v9 = vadd.f32 %v992_v48, %v1961_v44  ;;  %1470 = vlog2.f32 %v930_v61  ;;  %v2217_v61 = vld [vmem:[#allocation13_spill] sm:$0xff] }
 0x1f7   :  { %v1013_v8 = vadd.f32 %v960_v6, %v1963_v46 }
 0x1f8   :  { %v1061_v13 = vsub.f32 %v2204_v1, %v1029_v9 }
 0x1f9   :  { %v1045_v20 = vsub.f32 %v2205_v26, %v1013_v8 }
 0x1fa   :  { %1093 = vst [vmem:[%s2172_s3 + $0xd0] sm:$0xff] %v1061_v13 }
 0x1fb   :  { %v1469_v30 = vpop.eup %1468  ;;  %1077 = vst [vmem:[%s2172_s3 + $0x50] sm:$0xff] %v1045_v20 }
 0x1fc   :  { %v1471_v24 = vpop.eup %1470  ;;  %v962_v2 = vmul.f32 0.6931472, %v1469_v30  ;;  %v932_v40 = vpop.xlane.xlu0 %931 }
 0x1fd   :  { %v994_v44 = vmul.f32 0.6931472, %v1471_v24  ;;  %v900_v31 = vpop.xlane.xlu2 %899  ;;  %1472 = vlog2.f32 %v932_v40 }
 0x1fe   :  { %v1014_v46 = vadd.f32 %v962_v2, %v1969_v23  ;;  %1474 = vlog2.f32 %v900_v31 }
 0x1ff   :  { %v1030_v60 = vadd.f32 %v994_v44, %v1971_v25 }
 0x200   :  { %v1046_v33 = vsub.f32 %v2206_v55, %v1014_v46 }
 0x201   :  { %v1062_v28 = vsub.f32 %v2207_v36, %v1030_v60 }
 0x202   :  { %1078 = vst [vmem:[%s2172_s3 + $0x58] sm:$0xff] %v1046_v33 }
 0x203   :  { %v1473_v34 = vpop.eup %1472  ;;  %1094 = vst [vmem:[%s2172_s3 + $0xd8] sm:$0xff] %v1062_v28 }
 0x204   :  { %v1475_v53 = vpop.eup %1474  ;;  %v996_v63 = vmul.f32 0.6931472, %v1473_v34  ;;  %v902_v23 = vpop.xlane.xlu0 %901 }
 0x205   :  { %v964_v32 = vmul.f32 0.6931472, %v1475_v53  ;;  %1476 = vlog2.f32 %v902_v23 }
 0x206   :  { %v1031_v43 = vadd.f32 %v996_v63, %v1977_v57  ;;  %v2209_v57 = vld [vmem:[#allocation15_spill] sm:$0xff] }
 0x207   :  { %v1015_v25 = vadd.f32 %v964_v32, %v1979_v7 }
 0x208   :  { %v1063_v22 = vsub.f32 %v2208_v47, %v1031_v43 }
 0x209   :  { %v1047_v54 = vsub.f32 %v1850_v35, %v1015_v25 }
 0x20a   :  { %1095 = vst [vmem:[%s2172_s3 + $0xe0] sm:$0xff] %v1063_v22 }
 0x20b   :  { %1079 = vst [vmem:[%s2172_s3 + $0x60] sm:$0xff] %v1047_v54  ;;  %v1477_v38 = vpop.eup %1476 }
 0x20c   :  { %v904_v42 = vpop.xlane.xlu1 %903  ;;  %v966_v4 = vmul.f32 0.6931472, %v1477_v38 }
 0x20d   :  { %1478 = vlog2.f32 %v904_v42 }
 0x20e   :  { %v1016_v52 = vadd.f32 %v966_v4, %v2209_v57 }
 0x210   :  { %v1048_v7 = vsub.f32 %v2210_v10, %v1016_v52 }
 0x212   :  { %1080 = vst [vmem:[%s2172_s3 + $0x68] sm:$0xff] %v1048_v7 }
 0x213   :  { %v1479_v21 = vpop.eup %1478 }
 0x214   :  { %v968_v35 = vmul.f32 0.6931472, %v1479_v21  ;;  %v934_v14 = vpop.xlane.xlu1 %933  ;;  %v938_v11 = vpop.xlane.xlu0 %937 }
 0x215   :  { %1480 = vlog2.f32 %v934_v14  ;;  %v906_v49 = vpop.xlane.xlu2 %905 }
 0x216   :  { %v1017_v50 = vadd.f32 %v968_v35, %v2211_v16  ;;  %1482 = vlog2.f32 %v906_v49 }
 0x217   :  { %1484 = vlog2.f32 %v938_v11 }
 0x218   :  { %v1049_v45 = vsub.f32 %v2212_v51, %v1017_v50 }
 0x21a   :  { %1081 = vst [vmem:[%s2172_s3 + $0x70] sm:$0xff] %v1049_v45 }
 0x21b   :  { %v1481_v29 = vpop.eup %1480 }
 0x21c   :  { %v1483_v17 = vpop.eup %1482  ;;  %v998_v12 = vmul.f32 0.6931472, %v1481_v29 }
 0x21d   :  { %v1485_v3 = vpop.eup %1484  ;;  %v970_v39 = vmul.f32 0.6931472, %v1483_v17  ;;  %v936_v15 = vpop.xlane.xlu2 %935 }
 0x21e   :  { %v1032_v56 = vadd.f32 %v998_v12, %v2213_v41  ;;  %v1002_v62 = vmul.f32 0.6931472, %v1485_v3  ;;  %1486 = vlog2.f32 %v936_v15 }
 0x21f   :  { %v1018_v27 = vadd.f32 %v970_v39, %v2001_v37 }
 0x220   :  { %v1064_v19 = vsub.f32 %v2214_v58, %v1032_v56  ;;  %v1034_v48 = vadd.f32 %v1002_v62, %v2215_v18 }
 0x221   :  { %v1050_v6 = vsub.f32 %v2216_v59, %v1018_v27 }
 0x222   :  { %1096 = vst [vmem:[%s2172_s3 + $0xe8] sm:$0xff] %v1064_v19  ;;  %v1066_v9 = vsub.f32 %v2217_v61, %v1034_v48 }
 0x223   :  { %1082 = vst [vmem:[%s2172_s3 + $0x78] sm:$0xff] %v1050_v6 }
 0x224   :  { %v1487_v8 = vpop.eup %1486  ;;  %1098 = vst [vmem:[%s2172_s3 + $0xf8] sm:$0xff] %v1066_v9 }
 0x225   :  { %v1000_v37 = vmul.f32 0.6931472, %v1487_v8 }
 0x227   :  { %v1033_v1 = vadd.f32 %v1000_v37, %v1993_v5 }
 0x229   :  { %v1065_v13 = vsub.f32 %v1871_v0, %v1033_v1 }
 0x22b   :  { %1097 = vst [vmem:[%s2172_s3 + $0xf0] sm:$0xff] %v1065_v13 }

// kernel: gcn_forward.4
= control target key start
LH: loop header
LB: loop body
LE: loop exit
PB: predicated region body
PF: predicated region fallthrough
CT: control target
= control target key end

     0   :  { %s1785_s1 = inlined_call_operand.vmem [shape: bf16[256,128], index: 1, kind: input, shape index: {}]   ;;  %s1786_s0 = inlined_call_operand.vmem [shape: bf16[256,256], index: 0, kind: input, shape index: {}]   ;;  %s1787_s2 = inlined_call_operand.vmem [shape: f32[1,128], index: 2, kind: input, shape index: {}]   ;;  %s1788_s3 = inlined_call_operand.vmem [shape: bf16[128,128], index: 3, kind: input, shape index: {}]   ;;  %s1789_s4 = inlined_call_operand.vmem [shape: bf16[256,128], index: 4, kind: output, shape index: {}]  }
   0x1   :  { %v1250_v0 = vld [vmem:[%s1785_s1 + $0x38] sm:$0xff]  ;;  %v1249_v2 = vld [vmem:[%s1785_s1 + $0x30] sm:$0xff]  ;;  %v1248_v4 = vld [vmem:[%s1785_s1 + $0x28] sm:$0xff] }
   0x2   :  { %v1258_v1 = vld [vmem:[%s1785_s1 + $0x78] sm:$0xff]  ;;  %405 = vmatpush.bf16.msra.mxu0 %v1250_v0  ;;  %1362 = vmatpush.bf16.msra.mxu3 %v1250_v0  ;;  %v1257_v3 = vld [vmem:[%s1785_s1 + $0x70] sm:$0xff]  ;;  %v1256_v5 = vld [vmem:[%s1785_s1 + $0x68] sm:$0xff] }
   0x3   :  { %494 = vmatpush.bf16.msra.mxu1 %v1258_v1  ;;  %v1247_v6 = vld [vmem:[%s1785_s1 + $0x20] sm:$0xff]  ;;  %v1246_v8 = vld [vmem:[%s1785_s1 + $0x18] sm:$0xff]  ;;  %v1245_v10 = vld [vmem:[%s1785_s1 + $0x10] sm:$0xff] }
   0x4   :  { %v1255_v7 = vld [vmem:[%s1785_s1 + $0x60] sm:$0xff]  ;;  %v1254_v9 = vld [vmem:[%s1785_s1 + $0x58] sm:$0xff]  ;;  %v1253_v11 = vld [vmem:[%s1785_s1 + $0x50] sm:$0xff] }
   0x5   :  { %v1244_v12 = vld [vmem:[%s1785_s1 + $0x8] sm:$0xff]  ;;  %v1243_v14 = vld [vmem:[%s1785_s1] sm:$0xff]  ;;  %v997_v25 = vld [vmem:[%s1786_s0 + $0x10] sm:$0xf] }
   0x6   :  { %406 = vmatpush.bf16.msra.mxu0 %v1249_v2  ;;  %1363 = vmatpush.bf16.msra.mxu3 %v1249_v2  ;;  %v1252_v13 = vld [vmem:[%s1785_s1 + $0x48] sm:$0xff]  ;;  %v989_v15 = vld [vmem:[%s1786_s0] sm:$0xf]  ;;  %v1211_v20 = vld [vmem:[%s1786_s0 + $0x4] sm:$0xf] }
   0x7   :  { %495 = vmatpush.bf16.msra.mxu1 %v1257_v3  ;;  %v1212_v16 = vld [vmem:[%s1786_s0 + $0x4] sm:$0xf0]  ;;  %v1085_v17 = vld [vmem:[%s1786_s0 + $0xc0] sm:$0xf]  ;;  %v991_v21 = vld [vmem:[%s1786_s0 + $0x8] sm:$0xf0] }
   0x8   :  { %v1236_v18 = vld [vmem:[%s1786_s0 + $0xc4] sm:$0xf0]  ;;  %v1251_v19 = vld [vmem:[%s1785_s1 + $0x40] sm:$0xff]  ;;  %v990_v22 = vor.u32 %v1212_v16, %v989_v15  ;;  %v994_v24 = vor.u32 %v1211_v20, %v991_v21  ;;  %v1214_v26 = vld [vmem:[%s1786_s0 + $0x14] sm:$0xf0] }
   0x9   :  { %v1086_v23 = vor.u32 %v1236_v18, %v1085_v17  ;;  %v1093_v27 = vld [vmem:[%s1786_s0 + $0xd0] sm:$0xf]  ;;  %v1238_v28 = vld [vmem:[%s1786_s0 + $0xd4] sm:$0xf0]  ;;  %v1213_v29 = vld [vmem:[%s1786_s0 + $0x14] sm:$0xf]  ;;  %v998_v31 = vor.u32 %v1214_v26, %v997_v25 }
   0xa   :  { %407 = vmatpush.bf16.msra.mxu0 %v1248_v4  ;;  %1364 = vmatpush.bf16.msra.mxu3 %v1248_v4  ;;  %v999_v30 = vld [vmem:[%s1786_s0 + $0x18] sm:$0xf0]  ;;  %v1094_v32 = vor.u32 %v1238_v28, %v1093_v27  ;;  %v1005_v34 = vld [vmem:[%s1786_s0 + $0x20] sm:$0xf]  ;;  %v1216_v35 = vld [vmem:[%s1786_s0 + $0x24] sm:$0xf0] }
   0xb   :  { %496 = vmatpush.bf16.msra.mxu1 %v1256_v5  ;;  %v1002_v33 = vor.u32 %v1213_v29, %v999_v30  ;;  %v1101_v36 = vld [vmem:[%s1786_s0 + $0xe0] sm:$0xf]  ;;  %v1240_v37 = vld [vmem:[%s1786_s0 + $0xe4] sm:$0xf0]  ;;  %v1215_v38 = vld [vmem:[%s1786_s0 + $0x24] sm:$0xf]  ;;  %v1006_v40 = vor.u32 %v1216_v35, %v1005_v34 }
   0xc   :  { %v1007_v39 = vld [vmem:[%s1786_s0 + $0x28] sm:$0xf0]  ;;  %v1102_v41 = vor.u32 %v1240_v37, %v1101_v36  ;;  %v1013_v43 = vld [vmem:[%s1786_s0 + $0x30] sm:$0xf]  ;;  %v1218_v44 = vld [vmem:[%s1786_s0 + $0x34] sm:$0xf0] }
   0xd   :  { %v1010_v42 = vor.u32 %v1215_v38, %v1007_v39  ;;  %v1109_v45 = vld [vmem:[%s1786_s0 + $0xf0] sm:$0xf]  ;;  %v1242_v46 = vld [vmem:[%s1786_s0 + $0xf4] sm:$0xf0]  ;;  %v1217_v47 = vld [vmem:[%s1786_s0 + $0x34] sm:$0xf]  ;;  %v1014_v49 = vor.u32 %v1218_v44, %v1013_v43 }
   0xe   :  { %408 = vmatpush.bf16.msra.mxu0 %v1247_v6  ;;  %1365 = vmatpush.bf16.msra.mxu3 %v1247_v6  ;;  %v1015_v48 = vld [vmem:[%s1786_s0 + $0x38] sm:$0xf0]  ;;  %v1110_v50 = vor.u32 %v1242_v46, %v1109_v45  ;;  %v1021_v52 = vld [vmem:[%s1786_s0 + $0x40] sm:$0xf]  ;;  %v1220_v53 = vld [vmem:[%s1786_s0 + $0x44] sm:$0xf0] }
   0xf   :  { %497 = vmatpush.bf16.msra.mxu1 %v1255_v7  ;;  %v1018_v51 = vor.u32 %v1217_v47, %v1015_v48  ;;  %v1235_v54 = vld [vmem:[%s1786_s0 + $0xc4] sm:$0xf]  ;;  %v1087_v55 = vld [vmem:[%s1786_s0 + $0xc8] sm:$0xf0]  ;;  %v1022_v58 = vor.u32 %v1220_v53, %v1021_v52  ;;  %v1266_v61 = vld [vmem:[%s1788_s3 + $0x38] sm:$0xff] }
  0x10   :  { %v1219_v56 = vld [vmem:[%s1786_s0 + $0x44] sm:$0xf]  ;;  %v1023_v57 = vld [vmem:[%s1786_s0 + $0x48] sm:$0xf0]  ;;  %v1090_v59 = vor.u32 %v1235_v54, %v1087_v55  ;;  %830 = vmatpush.bf16.msra.mxu2 %v1266_v61  ;;  %v1029_v62 = vld [vmem:[%s1786_s0 + $0x50] sm:$0xf] }
  0x11   :  { %v1026_v60 = vor.u32 %v1219_v56, %v1023_v57  ;;  %v1222_v63 = vld [vmem:[%s1786_s0 + $0x54] sm:$0xf0]  ;;  %v1237_v0 = vld [vmem:[%s1786_s0 + $0xd4] sm:$0xf]  ;;  %v1039_v15 = vld [vmem:[%s1786_s0 + $0x68] sm:$0xf0] }
  0x12   :  { %409 = vmatpush.bf16.msra.mxu0 %v1246_v8  ;;  %1366 = vmatpush.bf16.msra.mxu3 %v1246_v8  ;;  %v1221_v2 = vld [vmem:[%s1786_s0 + $0x54] sm:$0xf]  ;;  %v1030_v4 = vor.u32 %v1222_v63, %v1029_v62  ;;  %v1264_v8 = vld [vmem:[%s1788_s3 + $0x28] sm:$0xff]  ;;  %v1111_v25 = vld [vmem:[%s1786_s0 + $0xf8] sm:$0xf0] }
  0x13   :  { %498 = vmatpush.bf16.msra.mxu1 %v1254_v9  ;;  %v1261_v20 = vld [vmem:[%s1788_s3 + $0x10] sm:$0xff]  ;;  %v1260_v21 = vld [vmem:[%s1788_s3 + $0x8] sm:$0xff]  ;;  %v1047_v27 = vld [vmem:[%s1786_s0 + $0x78] sm:$0xf0] }
  0x14   :  { %v1225_v26 = vld [vmem:[%s1786_s0 + $0x74] sm:$0xf]  ;;  %v1259_v28 = vld [vmem:[%s1788_s3] sm:$0xff]  ;;  %v1055_v35 = vld [vmem:[%s1786_s0 + $0x88] sm:$0xf0] }
  0x15   :  { %v1227_v34 = vld [vmem:[%s1786_s0 + $0x84] sm:$0xf]  ;;  %v1061_v48 = vld [vmem:[%s1786_s0 + $0x90] sm:$0xf] }
  0x16   :  { %410 = vmatpush.bf16.msra.mxu0 %v1245_v10  ;;  %1367 = vmatpush.bf16.msra.mxu3 %v1245_v10  ;;  %v1037_v10 = vld [vmem:[%s1786_s0 + $0x60] sm:$0xf]  ;;  %v1058_v38 = vor.u32 %v1227_v34, %v1055_v35 }
  0x17   :  { %499 = vmatpush.bf16.msra.mxu1 %v1253_v11 }
  0x1a   :  { %411 = vmatpush.bf16.msra.mxu0 %v1244_v12  ;;  %1368 = vmatpush.bf16.msra.mxu3 %v1244_v12  ;;  %v1239_v12 = vld [vmem:[%s1786_s0 + $0xe4] sm:$0xf] }
  0x1b   :  { %500 = vmatpush.bf16.msra.mxu1 %v1252_v13 }
  0x1e   :  { %412 = vmatpush.bf16.msra.mxu0 %v1243_v14  ;;  %1369 = vmatpush.bf16.msra.mxu3 %v1243_v14  ;;  %v1223_v14 = vld [vmem:[%s1786_s0 + $0x64] sm:$0xf] }
  0x1f   :  { %501 = vmatpush.bf16.msra.mxu1 %v1251_v19  ;;  %v1042_v18 = vor.u32 %v1223_v14, %v1039_v15 }
  0x21   :  { %413 = vmatmul.bf16.vlgmr.msra.gmra.mxu0 %v990_v22  ;;  %473 = vmatmul.bf16.vlgmr.msra.gmra.mxu3 %v1086_v23  ;;  %v1045_v22 = vld [vmem:[%s1786_s0 + $0x70] sm:$0xf]  ;;  %v1226_v23 = vld [vmem:[%s1786_s0 + $0x74] sm:$0xf0] }
  0x22   :  { %1370 = vmatpush.bf16.msrb.mxu3 %v1258_v1  ;;  %502 = vmatmul.bf16.vlgmr.msra.gmra.mxu1 %v994_v24  ;;  %v1095_v1 = vld [vmem:[%s1786_s0 + $0xd8] sm:$0xf0]  ;;  %v1241_v24 = vld [vmem:[%s1786_s0 + $0xf4] sm:$0xf]  ;;  %v1046_v29 = vor.u32 %v1226_v23, %v1045_v22  ;;  %v1077_v22 = vld [vmem:[%s1786_s0 + $0xb0] sm:$0xf] }
  0x23   :  { %v1114_v30 = vor.u32 %v1241_v24, %v1111_v25  ;;  %v1234_v23 = vld [vmem:[%s1786_s0 + $0xb4] sm:$0xf0]  ;;  %v1233_v24 = vld [vmem:[%s1786_s0 + $0xb4] sm:$0xf]  ;;  %v1079_v25 = vld [vmem:[%s1786_s0 + $0xb8] sm:$0xf0] }
  0x26   :  { %1371 = vmatpush.bf16.msrb.mxu3 %v1257_v3  ;;  %v1031_v3 = vld [vmem:[%s1786_s0 + $0x58] sm:$0xf0] }
  0x27   :  { %v1034_v6 = vor.u32 %v1221_v2, %v1031_v3  ;;  %v1069_v3 = vld [vmem:[%s1786_s0 + $0xa0] sm:$0xf] }
  0x2a   :  { %1372 = vmatpush.bf16.msrb.mxu3 %v1256_v5  ;;  %v1098_v5 = vor.u32 %v1237_v0, %v1095_v1 }
  0x2e   :  { %1373 = vmatpush.bf16.msrb.mxu3 %v1255_v7  ;;  %v1265_v7 = vld [vmem:[%s1788_s3 + $0x30] sm:$0xff] }
  0x2f   :  { %831 = vmatpush.bf16.msra.mxu2 %v1265_v7 }
  0x31   :  { %418 = vmatmul.bf16.gmra.mxu0 %v998_v31  ;;  %478 = vmatmul.bf16.gmra.mxu3 %v1094_v32  ;;  %v1050_v31 = vor.u32 %v1225_v26, %v1047_v27  ;;  %v1053_v32 = vld [vmem:[%s1786_s0 + $0x80] sm:$0xf] }
  0x32   :  { %1374 = vmatpush.bf16.msrb.mxu3 %v1254_v9  ;;  %507 = vmatmul.bf16.gmra.mxu1 %v1002_v33  ;;  %v1263_v9 = vld [vmem:[%s1788_s3 + $0x20] sm:$0xff]  ;;  %v1228_v33 = vld [vmem:[%s1786_s0 + $0x84] sm:$0xf0] }
  0x33   :  { %832 = vmatpush.bf16.msra.mxu2 %v1264_v8  ;;  %v1054_v36 = vor.u32 %v1228_v33, %v1053_v32  ;;  %v1082_v32 = vor.u32 %v1233_v24, %v1079_v25 }
  0x36   :  { %1375 = vmatpush.bf16.msrb.mxu3 %v1253_v11  ;;  %v1224_v11 = vld [vmem:[%s1786_s0 + $0x64] sm:$0xf0] }
  0x37   :  { %833 = vmatpush.bf16.msra.mxu2 %v1263_v9  ;;  %v1038_v16 = vor.u32 %v1224_v11, %v1037_v10 }
  0x3a   :  { %1376 = vmatpush.bf16.msrb.mxu3 %v1252_v13  ;;  %v1103_v13 = vld [vmem:[%s1786_s0 + $0xe8] sm:$0xf0] }
  0x3b   :  { %v1106_v17 = vor.u32 %v1239_v12, %v1103_v13 }
  0x3e   :  { %1377 = vmatpush.bf16.msrb.mxu3 %v1251_v19  ;;  %v1262_v19 = vld [vmem:[%s1788_s3 + $0x18] sm:$0xff] }
  0x3f   :  { %834 = vmatpush.bf16.msra.mxu2 %v1262_v19 }
  0x41   :  { %423 = vmatmul.bf16.gmra.mxu0 %v1006_v40  ;;  %483 = vmatmul.bf16.gmra.mxu3 %v1102_v41  ;;  %v1643_v41 = vld [vmem:[%s1787_s2] ss:$0 sm:$0xff] }
  0x42   :  { %512 = vmatmul.bf16.gmra.mxu1 %v1010_v42  ;;  %1378 = vmatpush.bf16.msra.mxu3 %v1266_v61 }
  0x43   :  { %835 = vmatpush.bf16.msra.mxu2 %v1261_v20 }
  0x46   :  { %1379 = vmatpush.bf16.msra.mxu3 %v1265_v7 }
  0x47   :  { %836 = vmatpush.bf16.msra.mxu2 %v1260_v21 }
  0x4a   :  { %1380 = vmatpush.bf16.msra.mxu3 %v1264_v8 }
  0x4b   :  { %837 = vmatpush.bf16.msra.mxu2 %v1259_v28 }
  0x4e   :  { %1381 = vmatpush.bf16.msra.mxu3 %v1263_v9 }
  0x51   :  { %428 = vmatmul.bf16.gmra.mxu0 %v1014_v49  ;;  %488 = vmatmul.bf16.gmra.mxu3 %v1110_v50  ;;  %v1230_v49 = vld [vmem:[%s1786_s0 + $0x94] sm:$0xf0]  ;;  %v1229_v50 = vld [vmem:[%s1786_s0 + $0x94] sm:$0xf] }
  0x52   :  { %517 = vmatmul.bf16.gmra.mxu1 %v1018_v51  ;;  %1382 = vmatpush.bf16.msra.mxu3 %v1262_v19  ;;  %v1063_v51 = vld [vmem:[%s1786_s0 + $0x98] sm:$0xf0]  ;;  %v1062_v55 = vor.u32 %v1230_v49, %v1061_v48 }
  0x56   :  { %1383 = vmatpush.bf16.msra.mxu3 %v1261_v20 }
  0x5a   :  { %1384 = vmatpush.bf16.msra.mxu3 %v1260_v21 }
  0x5e   :  { %1385 = vmatpush.bf16.msra.mxu3 %v1259_v28 }
  0x61   :  { %433 = vmatmul.bf16.gmra.mxu0 %v1022_v58  ;;  %562 = vmatmul.bf16.vlgmr.msrb.gmra.mxu3 %v1090_v59  ;;  %v1066_v58 = vor.u32 %v1229_v50, %v1063_v51 }
  0x62   :  { %522 = vmatmul.bf16.gmra.mxu1 %v1026_v60 }
  0x71   :  { %438 = vmatmul.bf16.gmra.mxu0 %v1030_v4  ;;  %567 = vmatmul.bf16.gmra.mxu3 %v1098_v5  ;;  %v1232_v4 = vld [vmem:[%s1786_s0 + $0xa4] sm:$0xf0]  ;;  %v1231_v5 = vld [vmem:[%s1786_s0 + $0xa4] sm:$0xf] }
  0x72   :  { %527 = vmatmul.bf16.gmra.mxu1 %v1034_v6  ;;  %v1071_v6 = vld [vmem:[%s1786_s0 + $0xa8] sm:$0xf0]  ;;  %v1070_v10 = vor.u32 %v1232_v4, %v1069_v3 }
  0x73   :  { %v1074_v13 = vor.u32 %v1231_v5, %v1071_v6 }
  0x81   :  { %443 = vmatmul.bf16.gmra.mxu0 %v1038_v16  ;;  %572 = vmatmul.bf16.gmra.mxu3 %v1106_v17 }
  0x82   :  { %532 = vmatmul.bf16.gmra.mxu1 %v1042_v18 }
  0x91   :  { %448 = vmatmul.bf16.gmra.mxu0 %v1046_v29  ;;  %577 = vmatmul.bf16.gmra.mxu3 %v1114_v30  ;;  %v1078_v29 = vor.u32 %v1234_v23, %v1077_v22 }
  0x92   :  { %537 = vmatmul.bf16.gmra.mxu1 %v1050_v31 }
  0x9e   :  { %v414_v37 = vpop.f32.mrf.mxu0 }
  0x9f   :  { %v503_v39 = vpop.f32.mrf.mxu1 }
  0xa0   :  { %v504_v40 = vadd.f32 %v503_v39, %v414_v37 }
  0xa1   :  { %453 = vmatmul.bf16.gmra.mxu0 %v1054_v36 }
  0xa2   :  { %542 = vmatmul.bf16.gmra.mxu1 %v1058_v38  ;;  %v686_v45 = vadd.f32 %v1643_v41, %v504_v40 }
  0xa4   :  { %v1645_v42 = vpop.f32.mrf.mxu3  ;;  %v718_v52 = vmax.f32 %v686_v45, 0.0 }
  0xa6   :  { %v416_v43 = vpop.f32.mrf.mxu0 }
  0xa7   :  { %v505_v44 = vpop.f32.mrf.mxu1 }
  0xa8   :  { %v506_v46 = vadd.f32 %v505_v44, %v416_v43 }
  0xaa   :  { %v687_v47 = vadd.f32 %v1643_v41, %v506_v46 }
  0xac   :  { %v719_v53 = vmax.f32 %v687_v47, 0.0  ;;  %v1661_v54 = vpop.f32.mrf.mxu3 }
  0xae   :  { %v419_v56 = vpop.f32.mrf.mxu0  ;;  %v750_v57 = vpack.c.bf16 %v719_v53, %v718_v52 }
  0xaf   :  { %v508_v59 = vpop.f32.mrf.mxu1 }
  0xb0   :  { %838 = vmatmul.bf16.vlgmr.msra.gmra.mxu2 %v750_v57  ;;  %v509_v60 = vadd.f32 %v508_v59, %v419_v56 }
  0xb1   :  { %458 = vmatmul.bf16.gmra.mxu0 %v1062_v55 }
  0xb2   :  { %547 = vmatmul.bf16.gmra.mxu1 %v1066_v58  ;;  %v688_v0 = vadd.f32 %v1643_v41, %v509_v60 }
  0xb4   :  { %v1663_v61 = vpop.f32.mrf.mxu3  ;;  %v720_v7 = vmax.f32 %v688_v0, 0.0 }
  0xb6   :  { %v421_v62 = vpop.f32.mrf.mxu0 }
  0xb7   :  { %v510_v63 = vpop.f32.mrf.mxu1 }
  0xb8   :  { %v511_v1 = vadd.f32 %v510_v63, %v421_v62 }
  0xba   :  { %v689_v2 = vadd.f32 %v1643_v41, %v511_v1 }
  0xbc   :  { %v721_v8 = vmax.f32 %v689_v2, 0.0  ;;  %v1679_v9 = vpop.f32.mrf.mxu3 }
  0xbe   :  { %v424_v11 = vpop.f32.mrf.mxu0  ;;  %v751_v12 = vpack.c.bf16 %v721_v8, %v720_v7 }
  0xbf   :  { %v513_v14 = vpop.f32.mrf.mxu1 }
  0xc0   :  { %843 = vmatmul.bf16.gmra.mxu2 %v751_v12  ;;  %v514_v15 = vadd.f32 %v513_v14, %v424_v11 }
  0xc1   :  { %463 = vmatmul.bf16.gmra.mxu0 %v1070_v10 }
  0xc2   :  { %552 = vmatmul.bf16.gmra.mxu1 %v1074_v13  ;;  %v690_v19 = vadd.f32 %v1643_v41, %v514_v15 }
  0xc4   :  { %v1681_v16 = vpop.f32.mrf.mxu3  ;;  %v722_v26 = vmax.f32 %v690_v19, 0.0 }
  0xc6   :  { %v426_v17 = vpop.f32.mrf.mxu0 }
  0xc7   :  { %v515_v18 = vpop.f32.mrf.mxu1 }
  0xc8   :  { %v516_v20 = vadd.f32 %v515_v18, %v426_v17 }
  0xca   :  { %v691_v21 = vadd.f32 %v1643_v41, %v516_v20 }
  0xcc   :  { %v723_v27 = vmax.f32 %v691_v21, 0.0  ;;  %v1697_v28 = vpop.f32.mrf.mxu3 }
  0xce   :  { %v429_v30 = vpop.f32.mrf.mxu0  ;;  %v752_v31 = vpack.c.bf16 %v723_v27, %v722_v26 }
  0xcf   :  { %v518_v33 = vpop.f32.mrf.mxu1 }
  0xd0   :  { %848 = vmatmul.bf16.gmra.mxu2 %v752_v31  ;;  %v519_v34 = vadd.f32 %v518_v33, %v429_v30 }
  0xd1   :  { %468 = vmatmul.bf16.gmra.mxu0 %v1078_v29 }
  0xd2   :  { %557 = vmatmul.bf16.gmra.mxu1 %v1082_v32  ;;  %v692_v38 = vadd.f32 %v1643_v41, %v519_v34 }
  0xd4   :  { %v1699_v35 = vpop.f32.mrf.mxu3  ;;  %v724_v43 = vmax.f32 %v692_v38, 0.0 }
  0xd6   :  { %v431_v36 = vpop.f32.mrf.mxu0 }
  0xd7   :  { %v520_v37 = vpop.f32.mrf.mxu1 }
  0xd8   :  { %v521_v39 = vadd.f32 %v520_v37, %v431_v36 }
  0xda   :  { %v693_v40 = vadd.f32 %v1643_v41, %v521_v39 }
  0xdc   :  { %v725_v44 = vmax.f32 %v693_v40, 0.0  ;;  %v1703_v45 = vpop.f32.mrf.mxu3 }
  0xde   :  { %v434_v46 = vpop.f32.mrf.mxu0  ;;  %v753_v47 = vpack.c.bf16 %v725_v44, %v724_v43 }
  0xdf   :  { %v523_v48 = vpop.f32.mrf.mxu1 }
  0xe0   :  { %853 = vmatmul.bf16.gmra.mxu2 %v753_v47  ;;  %v524_v49 = vadd.f32 %v523_v48, %v434_v46 }
  0xe2   :  { %v694_v53 = vadd.f32 %v1643_v41, %v524_v49 }
  0xe4   :  { %v563_v50 = vpop.f32.mrf.mxu3  ;;  %v726_v58 = vmax.f32 %v694_v53, 0.0 }
  0xe5   :  { %v564_v56 = vadd.f32 %v563_v50, %v1645_v42 }
  0xe6   :  { %v436_v51 = vpop.f32.mrf.mxu0 }
  0xe7   :  { %v525_v52 = vpop.f32.mrf.mxu1  ;;  %v710_v62 = vadd.f32 %v1643_v41, %v564_v56 }
  0xe8   :  { %v526_v55 = vadd.f32 %v525_v52, %v436_v51 }
  0xe9   :  { %v742_v4 = vmax.f32 %v710_v62, 0.0 }
  0xea   :  { %v695_v57 = vadd.f32 %v1643_v41, %v526_v55 }
  0xec   :  { %v727_v59 = vmax.f32 %v695_v57, 0.0  ;;  %v565_v60 = vpop.f32.mrf.mxu3 }
  0xed   :  { %v566_v63 = vadd.f32 %v565_v60, %v1661_v54 }
  0xee   :  { %v439_v0 = vpop.f32.mrf.mxu0  ;;  %v754_v1 = vpack.c.bf16 %v727_v59, %v726_v58 }
  0xef   :  { %v711_v2 = vadd.f32 %v1643_v41, %v566_v63  ;;  %v528_v3 = vpop.f32.mrf.mxu1 }
  0xf0   :  { %858 = vmatmul.bf16.gmra.mxu2 %v754_v1  ;;  %v529_v7 = vadd.f32 %v528_v3, %v439_v0 }
  0xf1   :  { %v743_v5 = vmax.f32 %v711_v2, 0.0 }
  0xf2   :  { %v696_v11 = vadd.f32 %v1643_v41, %v529_v7 }
  0xf3   :  { %v762_v6 = vpack.c.bf16 %v743_v5, %v742_v4 }
  0xf4   :  { %v568_v42 = vpop.f32.mrf.mxu3  ;;  %v728_v14 = vmax.f32 %v696_v11, 0.0 }
  0xf5   :  { %898 = vmatmul.bf16.vlgmr.msra.gmra.mxu3 %v762_v6  ;;  %v569_v13 = vadd.f32 %v568_v42, %v1663_v61 }
  0xf6   :  { %v441_v8 = vpop.f32.mrf.mxu0 }
  0xf7   :  { %v530_v10 = vpop.f32.mrf.mxu1  ;;  %v712_v18 = vadd.f32 %v1643_v41, %v569_v13 }
  0xf8   :  { %v531_v12 = vadd.f32 %v530_v10, %v441_v8 }
  0xf9   :  { %v744_v24 = vmax.f32 %v712_v18, 0.0 }
  0xfa   :  { %v697_v54 = vadd.f32 %v1643_v41, %v531_v12 }
  0xfc   :  { %v729_v15 = vmax.f32 %v697_v54, 0.0  ;;  %v570_v17 = vpop.f32.mrf.mxu3 }
  0xfd   :  { %v571_v19 = vadd.f32 %v570_v17, %v1679_v9 }
  0xfe   :  { %v444_v20 = vpop.f32.mrf.mxu0  ;;  %v755_v21 = vpack.c.bf16 %v729_v15, %v728_v14 }
  0xff   :  { %v713_v22 = vadd.f32 %v1643_v41, %v571_v19  ;;  %v533_v23 = vpop.f32.mrf.mxu1 }
 0x100   :  { %863 = vmatmul.bf16.gmra.mxu2 %v755_v21  ;;  %v534_v27 = vadd.f32 %v533_v23, %v444_v20 }
 0x101   :  { %v745_v25 = vmax.f32 %v713_v22, 0.0 }
 0x102   :  { %v698_v31 = vadd.f32 %v1643_v41, %v534_v27 }
 0x103   :  { %v763_v26 = vpack.c.bf16 %v745_v25, %v744_v24 }
 0x104   :  { %v573_v61 = vpop.f32.mrf.mxu3  ;;  %v730_v34 = vmax.f32 %v698_v31, 0.0 }
 0x105   :  { %903 = vmatmul.bf16.gmra.mxu3 %v763_v26  ;;  %v574_v33 = vadd.f32 %v573_v61, %v1681_v16 }
 0x106   :  { %v446_v29 = vpop.f32.mrf.mxu0 }
 0x107   :  { %v535_v30 = vpop.f32.mrf.mxu1  ;;  %v714_v38 = vadd.f32 %v1643_v41, %v574_v33 }
 0x108   :  { %v536_v32 = vadd.f32 %v535_v30, %v446_v29 }
 0x109   :  { %v746_v47 = vmax.f32 %v714_v38, 0.0 }
 0x10a   :  { %v699_v9 = vadd.f32 %v1643_v41, %v536_v32 }
 0x10c   :  { %v731_v36 = vmax.f32 %v699_v9, 0.0  ;;  %v575_v37 = vpop.f32.mrf.mxu3 }
 0x10d   :  { %v576_v39 = vadd.f32 %v575_v37, %v1697_v28 }
 0x10e   :  { %v449_v40 = vpop.f32.mrf.mxu0  ;;  %v756_v43 = vpack.c.bf16 %v731_v36, %v730_v34 }
 0x10f   :  { %v715_v44 = vadd.f32 %v1643_v41, %v576_v39  ;;  %v538_v46 = vpop.f32.mrf.mxu1 }
 0x110   :  { %868 = vmatmul.bf16.gmra.mxu2 %v756_v43  ;;  %v539_v50 = vadd.f32 %v538_v46, %v449_v40 }
 0x111   :  { %v747_v48 = vmax.f32 %v715_v44, 0.0 }
 0x112   :  { %v700_v53 = vadd.f32 %v1643_v41, %v539_v50 }
 0x113   :  { %v764_v49 = vpack.c.bf16 %v747_v48, %v746_v47 }
 0x114   :  { %v578_v16 = vpop.f32.mrf.mxu3  ;;  %v732_v57 = vmax.f32 %v700_v53, 0.0 }
 0x115   :  { %908 = vmatmul.bf16.gmra.mxu3 %v764_v49  ;;  %v579_v56 = vadd.f32 %v578_v16, %v1699_v35 }
 0x116   :  { %v451_v51 = vpop.f32.mrf.mxu0 }
 0x117   :  { %v540_v52 = vpop.f32.mrf.mxu1  ;;  %v716_v60 = vadd.f32 %v1643_v41, %v579_v56 }
 0x118   :  { %v541_v55 = vadd.f32 %v540_v52, %v451_v51 }
 0x119   :  { %v748_v3 = vmax.f32 %v716_v60, 0.0 }
 0x11a   :  { %v701_v28 = vadd.f32 %v1643_v41, %v541_v55 }
 0x11c   :  { %v733_v58 = vmax.f32 %v701_v28, 0.0  ;;  %v580_v59 = vpop.f32.mrf.mxu3 }
 0x11d   :  { %v581_v62 = vadd.f32 %v580_v59, %v1703_v45 }
 0x11e   :  { %v454_v63 = vpop.f32.mrf.mxu0  ;;  %v757_v0 = vpack.c.bf16 %v733_v58, %v732_v57 }
 0x11f   :  { %v717_v1 = vadd.f32 %v1643_v41, %v581_v62  ;;  %v543_v2 = vpop.f32.mrf.mxu1 }
 0x120   :  { %873 = vmatmul.bf16.gmra.mxu2 %v757_v0  ;;  %v544_v6 = vadd.f32 %v543_v2, %v454_v63 }
 0x121   :  { %v749_v4 = vmax.f32 %v717_v1, 0.0 }
 0x122   :  { %v702_v42 = vadd.f32 %v1643_v41, %v544_v6 }
 0x123   :  { %v765_v5 = vpack.c.bf16 %v749_v4, %v748_v3 }
 0x124   :  { %v734_v11 = vmax.f32 %v702_v42, 0.0 }
 0x125   :  { %913 = vmatmul.bf16.gmra.mxu3 %v765_v5 }
 0x126   :  { %v456_v35 = vpop.f32.mrf.mxu0 }
 0x127   :  { %v545_v7 = vpop.f32.mrf.mxu1 }
 0x128   :  { %v546_v8 = vadd.f32 %v545_v7, %v456_v35 }
 0x12a   :  { %v703_v10 = vadd.f32 %v1643_v41, %v546_v8 }
 0x12c   :  { %v735_v45 = vmax.f32 %v703_v10, 0.0 }
 0x12e   :  { %v459_v12 = vpop.f32.mrf.mxu0  ;;  %v758_v13 = vpack.c.bf16 %v735_v45, %v734_v11 }
 0x12f   :  { %v548_v54 = vpop.f32.mrf.mxu1 }
 0x130   :  { %878 = vmatmul.bf16.gmra.mxu2 %v758_v13  ;;  %v549_v15 = vadd.f32 %v548_v54, %v459_v12 }
 0x132   :  { %v704_v19 = vadd.f32 %v1643_v41, %v549_v15 }
 0x133   :  { %v839_v14 = vpop.f32.mrf.mxu2 }
 0x134   :  { %v736_v23 = vmax.f32 %v704_v19, 0.0 }
 0x136   :  { %v461_v17 = vpop.f32.mrf.mxu0 }
 0x137   :  { %v550_v18 = vpop.f32.mrf.mxu1 }
 0x138   :  { %v551_v20 = vadd.f32 %v550_v18, %v461_v17 }
 0x13a   :  { %v705_v21 = vadd.f32 %v1643_v41, %v551_v20 }
 0x13b   :  { %v841_v22 = vpop.f32.mrf.mxu2 }
 0x13c   :  { %v737_v24 = vmax.f32 %v705_v21, 0.0  ;;  %v1270_v25 = vpack.c.bf16 %v841_v22, %v839_v14 }
 0x13e   :  { %1271 = vst [vmem:[%s1789_s4] sm:$0xff] %v1270_v25   ;;  %v464_v26 = vpop.f32.mrf.mxu0  ;;  %v759_v27 = vpack.c.bf16 %v737_v24, %v736_v23 }
 0x13f   :  { %v553_v61 = vpop.f32.mrf.mxu1 }
 0x140   :  { %883 = vmatmul.bf16.gmra.mxu2 %v759_v27  ;;  %v554_v30 = vadd.f32 %v553_v61, %v464_v26 }
 0x142   :  { %v706_v33 = vadd.f32 %v1643_v41, %v554_v30 }
 0x143   :  { %v844_v29 = vpop.f32.mrf.mxu2 }
 0x144   :  { %v738_v37 = vmax.f32 %v706_v33, 0.0 }
 0x146   :  { %v466_v31 = vpop.f32.mrf.mxu0 }
 0x147   :  { %v555_v32 = vpop.f32.mrf.mxu1 }
 0x148   :  { %v556_v9 = vadd.f32 %v555_v32, %v466_v31 }
 0x14a   :  { %v707_v34 = vadd.f32 %v1643_v41, %v556_v9 }
 0x14b   :  { %v846_v36 = vpop.f32.mrf.mxu2 }
 0x14c   :  { %v739_v38 = vmax.f32 %v707_v34, 0.0  ;;  %v1275_v39 = vpack.c.bf16 %v846_v36, %v844_v29 }
 0x14e   :  { %1347 = vst [vmem:[%s1789_s4 + $0x8] sm:$0xff] %v1275_v39   ;;  %v469_v40 = vpop.f32.mrf.mxu0  ;;  %v760_v43 = vpack.c.bf16 %v739_v38, %v738_v37 }
 0x14f   :  { %v558_v44 = vpop.f32.mrf.mxu1 }
 0x150   :  { %888 = vmatmul.bf16.gmra.mxu2 %v760_v43  ;;  %v559_v47 = vadd.f32 %v558_v44, %v469_v40 }
 0x152   :  { %v708_v50 = vadd.f32 %v1643_v41, %v559_v47 }
 0x153   :  { %v849_v46 = vpop.f32.mrf.mxu2 }
 0x154   :  { %v740_v53 = vmax.f32 %v708_v50, 0.0 }
 0x156   :  { %v471_v48 = vpop.f32.mrf.mxu0 }
 0x157   :  { %v560_v49 = vpop.f32.mrf.mxu1 }
 0x158   :  { %v561_v16 = vadd.f32 %v560_v49, %v471_v48 }
 0x15a   :  { %v709_v51 = vadd.f32 %v1643_v41, %v561_v16 }
 0x15b   :  { %v851_v52 = vpop.f32.mrf.mxu2 }
 0x15c   :  { %v741_v55 = vmax.f32 %v709_v51, 0.0  ;;  %v1280_v56 = vpack.c.bf16 %v851_v52, %v849_v46 }
 0x15e   :  { %1348 = vst [vmem:[%s1789_s4 + $0x10] sm:$0xff] %v1280_v56   ;;  %v761_v28 = vpack.c.bf16 %v741_v55, %v740_v53 }
 0x160   :  { %893 = vmatmul.bf16.gmra.mxu2 %v761_v28 }
 0x163   :  { %v854_v57 = vpop.f32.mrf.mxu2 }
 0x16b   :  { %v856_v58 = vpop.f32.mrf.mxu2 }
 0x16c   :  { %v1285_v59 = vpack.c.bf16 %v856_v58, %v854_v57 }
 0x16e   :  { %1349 = vst [vmem:[%s1789_s4 + $0x18] sm:$0xff] %v1285_v59  }
 0x173   :  { %v859_v60 = vpop.f32.mrf.mxu2 }
 0x178   :  { %v899_v62 = vpop.f32.mrf.mxu3 }
 0x17b   :  { %v861_v41 = vpop.f32.mrf.mxu2 }
 0x17c   :  { %v1290_v63 = vpack.c.bf16 %v861_v41, %v859_v60 }
 0x17e   :  { %1350 = vst [vmem:[%s1789_s4 + $0x20] sm:$0xff] %v1290_v63  }
 0x180   :  { %v901_v0 = vpop.f32.mrf.mxu3 }
 0x181   :  { %v1330_v1 = vpack.c.bf16 %v901_v0, %v899_v62 }
 0x183   :  { %1358 = vst [vmem:[%s1789_s4 + $0x60] sm:$0xff] %v1330_v1   ;;  %v864_v2 = vpop.f32.mrf.mxu2 }
 0x188   :  { %v904_v3 = vpop.f32.mrf.mxu3 }
 0x18b   :  { %v866_v4 = vpop.f32.mrf.mxu2 }
 0x18c   :  { %v1295_v5 = vpack.c.bf16 %v866_v4, %v864_v2 }
 0x18e   :  { %1351 = vst [vmem:[%s1789_s4 + $0x28] sm:$0xff] %v1295_v5  }
 0x190   :  { %v906_v6 = vpop.f32.mrf.mxu3 }
 0x191   :  { %v1335_v35 = vpack.c.bf16 %v906_v6, %v904_v3 }
 0x193   :  { %1359 = vst [vmem:[%s1789_s4 + $0x68] sm:$0xff] %v1335_v35   ;;  %v869_v7 = vpop.f32.mrf.mxu2 }
 0x198   :  { %v909_v42 = vpop.f32.mrf.mxu3 }
 0x19b   :  { %v871_v8 = vpop.f32.mrf.mxu2 }
 0x19c   :  { %v1300_v10 = vpack.c.bf16 %v871_v8, %v869_v7 }
 0x19e   :  { %1352 = vst [vmem:[%s1789_s4 + $0x30] sm:$0xff] %v1300_v10  }
 0x1a0   :  { %v911_v11 = vpop.f32.mrf.mxu3 }
 0x1a1   :  { %v1340_v45 = vpack.c.bf16 %v911_v11, %v909_v42 }
 0x1a3   :  { %1360 = vst [vmem:[%s1789_s4 + $0x70] sm:$0xff] %v1340_v45   ;;  %v874_v12 = vpop.f32.mrf.mxu2 }
 0x1a8   :  { %v914_v13 = vpop.f32.mrf.mxu3 }
 0x1ab   :  { %v876_v54 = vpop.f32.mrf.mxu2 }
 0x1ac   :  { %v1305_v14 = vpack.c.bf16 %v876_v54, %v874_v12 }
 0x1ae   :  { %1353 = vst [vmem:[%s1789_s4 + $0x38] sm:$0xff] %v1305_v14  }
 0x1b0   :  { %v916_v15 = vpop.f32.mrf.mxu3 }
 0x1b1   :  { %v1345_v17 = vpack.c.bf16 %v916_v15, %v914_v13 }
 0x1b3   :  { %1361 = vst [vmem:[%s1789_s4 + $0x78] sm:$0xff] %v1345_v17   ;;  %v879_v18 = vpop.f32.mrf.mxu2 }
 0x1bb   :  { %v881_v19 = vpop.f32.mrf.mxu2 }
 0x1bc   :  { %v1310_v20 = vpack.c.bf16 %v881_v19, %v879_v18 }
 0x1be   :  { %1354 = vst [vmem:[%s1789_s4 + $0x40] sm:$0xff] %v1310_v20  }
 0x1c3   :  { %v884_v21 = vpop.f32.mrf.mxu2 }
 0x1cb   :  { %v886_v22 = vpop.f32.mrf.mxu2 }
 0x1cc   :  { %v1315_v23 = vpack.c.bf16 %v886_v22, %v884_v21 }
 0x1ce   :  { %1355 = vst [vmem:[%s1789_s4 + $0x48] sm:$0xff] %v1315_v23  }
 0x1d3   :  { %v889_v24 = vpop.f32.mrf.mxu2 }
 0x1db   :  { %v891_v25 = vpop.f32.mrf.mxu2 }
 0x1dc   :  { %v1320_v26 = vpack.c.bf16 %v891_v25, %v889_v24 }
 0x1de   :  { %1356 = vst [vmem:[%s1789_s4 + $0x50] sm:$0xff] %v1320_v26  }
 0x1e3   :  { %v894_v27 = vpop.f32.mrf.mxu2 }
 0x1eb   :  { %v896_v61 = vpop.f32.mrf.mxu2 }
 0x1ec   :  { %v1325_v29 = vpack.c.bf16 %v896_v61, %v894_v27 }
 0x1ee   :  { %1357 = vst [vmem:[%s1789_s4 + $0x58] sm:$0xff] %v1325_v29  }

</bundles_post_ra>
